<compile_context>
chip_gen: v6e
topology: v6e:2x2x1
jax: 0.10.0
libtpu: 0.0.40
codegen_flags: <defaults>
</compile_context>

<pallas_src>
import functools
import math

import jax
import jax.numpy as jnp
from jax import lax
from jax.experimental import pallas as pl
from jax.experimental.pallas import tpu as pltpu

GN_EPS = 1e-5
HIGHEST = jax.lax.Precision.HIGHEST


def _self_attn_kernel(num_heads, num_groups,
                      x_ref, gamma_ref, beta_ref,
                      wqkv_ref, bqkv_ref, wproj_ref, bproj_ref,
                      o_ref):
    BB, C, N = x_ref.shape
    G = num_groups
    cpg = C // G
    d = C // num_heads
    inv_cnt = 1.0 / float(cpg * N)
    scale = 1.0 / math.sqrt(d)

    gamma = gamma_ref[...]          # (C, 1)  f32
    beta = beta_ref[...]            # (C, 1)  f32
    wqkv = wqkv_ref[...]            # (3C, C) bf16
    bqkv = bqkv_ref[...]            # (3C, 1) f32
    wproj = wproj_ref[...]          # (C, C)  bf16
    bproj = bproj_ref[...]          # (C, 1)  f32

    # Group-membership mask built in-register from iota (VPU only; avoids the
    # old one-hot operands and their tiny MXU pushes).
    c_idx = lax.broadcasted_iota(jnp.int32, (C, G), 0)
    g_lo = lax.broadcasted_iota(jnp.int32, (C, G), 1) * cpg
    onehot = ((c_idx >= g_lo) & (c_idx < g_lo + cpg)).astype(jnp.float32)  # (C, G)

    for bb in range(BB):            # static unroll; BB is small (usually 1)
        x = x_ref[bb]               # (C, N) f32

        # ---- GroupNorm: stats over (channels-in-group x spatial), VPU/XLU ----
        ch_sum = jnp.sum(x, axis=1, keepdims=True)                 # (C, 1)
        ch_sq = jnp.sum(x * x, axis=1, keepdims=True)              # (C, 1)
        gsum = jnp.sum(ch_sum * onehot, axis=0, keepdims=True)     # (1, G)
        gsq = jnp.sum(ch_sq * onehot, axis=0, keepdims=True)       # (1, G)
        gmean = gsum * inv_cnt
        # NOTE: single-pass E[x^2]-E[x]^2; adequate for unit-scale activations.
        gvar = gsq * inv_cnt - gmean * gmean
        ginv = lax.rsqrt(gvar + GN_EPS)
        mean_c = jnp.sum(onehot * gmean, axis=1, keepdims=True)    # (C, 1)
        inv_c = jnp.sum(onehot * ginv, axis=1, keepdims=True)      # (C, 1)
        aff = inv_c * gamma                                        # (C, 1)
        sh = beta - mean_c * aff                                   # (C, 1)
        hb = (x * aff + sh).astype(jnp.bfloat16)                   # (C, N) bf16

        # ---- QKV 1x1 conv: one (3C,C)@(C,N) bf16 MXU matmul, f32 accum -------
        qkv = lax.dot_general(wqkv, hb, (((1,), (0,)), ((), ())),
                              preferred_element_type=jnp.float32) + bqkv  # (3C, N)
        q = qkv[0 * C:1 * C].reshape(num_heads, d, N) * scale      # (h, d, N)
        k = qkv[1 * C:2 * C].reshape(num_heads, d, N)              # (h, d, N)
        v = qkv[2 * C:3 * C].reshape(num_heads, d, N)              # (h, d, N)

        # ---- Multi-head attention: heads as the batch dim of the dots --------
        qt = jnp.swapaxes(q, 1, 2).astype(jnp.bfloat16)            # (h, N, d)
        kb = k.astype(jnp.bfloat16)                                # (h, d, N)
        vb = v.astype(jnp.bfloat16)                                # (h, d, N)

        # scores[h, n, m] = sum_d q[h, d, n] * k[h, d, m]
        s = lax.dot_general(qt, kb, (((2,), (1,)), ((0,), (0,))),
                            preferred_element_type=jnp.float32)    # (h, N, N)
        s = s - jnp.max(s, axis=-1, keepdims=True)
        p = jnp.exp(s)
        p = p * pl.reciprocal(jnp.sum(p, axis=-1, keepdims=True), approx=True)
        pb = p.astype(jnp.bfloat16)

        # out[h, d, n] = sum_m v[h, d, m] * p[h, n, m]
        out = lax.dot_general(vb, pb, (((2,), (2,)), ((0,), (0,))),
                              preferred_element_type=jnp.float32)  # (h, d, N)
        attn_c = out.reshape(C, N).astype(jnp.bfloat16)            # (C, N)

        # ---- Output projection 1x1 conv + residual ---------------------------
        proj = lax.dot_general(wproj, attn_c, (((1,), (0,)), ((), ())),
                               preferred_element_type=jnp.float32)  # (C, N)
        o_ref[bb] = x + proj + bproj


def _pick_batch_block(B, N, C, bytes_limit=2 * 1024 * 1024):
    """Largest divisor of B whose x-slab fits a small VMEM budget while keeping
    >= 2 grid steps (so both v7x TensorCores still get work)."""
    best = 1
    for cand in range(2, B + 1):
        if B % cand:
            continue
        if B // cand < 2:
            continue
        if cand * N * C * 4 > bytes_limit:
            continue
        best = cand
    return best


def self_attention_2d(x_nchw, params, num_heads=4, num_groups=8,
                      batch_block=None):
    """Pallas implementation of SelfAttention2d.forward. x_nchw: (B,C,H,W) f32."""
    B, C, H, W = x_nchw.shape
    N = H * W
    assert C % num_groups == 0 and C % num_heads == 0

    if batch_block is None:
        batch_block = _pick_batch_block(B, N, C)
    assert B % batch_block == 0
    BB = batch_block

    # NCHW -> (B, C, N): a free reshape (no transpose, no extra HBM pass).
    x_cn = x_nchw.reshape(B, C, N)

    # MXU weights in bf16 (halves DMA bytes + VMEM residency); biases/affine f32.
    wqkv = params["wqkv"].astype(jnp.bfloat16)               # (3C, C) out x in
    bqkv = params["bqkv"].reshape(3 * C, 1).astype(jnp.float32)
    wproj = params["wproj"].astype(jnp.bfloat16)             # (C, C) out x in
    bproj = params["bproj"].reshape(C, 1).astype(jnp.float32)
    gamma = params["gamma"].reshape(C, 1).astype(jnp.float32)
    beta = params["beta"].reshape(C, 1).astype(jnp.float32)

    def full(shape):
        return pl.BlockSpec(shape, lambda b: (0,) * len(shape))

    cost = pl.CostEstimate(
        flops=int(B * (8 * N * C * C + 4 * N * N * C)),
        transcendentals=int(B * num_heads * N * N),
        bytes_accessed=int(2 * B * C * N * 4            # x in + out (f32)
                           + (3 * C * C + C * C) * 2    # bf16 weights
                           + 8 * C * 4),                # biases / affine
    )

    out_cn = pl.pallas_call(
        functools.partial(_self_attn_kernel, num_heads, num_groups),
        out_shape=jax.ShapeDtypeStruct((B, C, N), jnp.float32),
        grid_spec=pltpu.PrefetchScalarGridSpec(
            num_scalar_prefetch=0,
            grid=(B // BB,),
            in_specs=[
                pl.BlockSpec((BB, C, N), lambda b: (b, 0, 0)),  # x
                full((C, 1)),          # gamma
                full((C, 1)),          # beta
                full((3 * C, C)),      # Wqkv (bf16)
                full((3 * C, 1)),      # bqkv
                full((C, C)),          # Wproj (bf16)
                full((C, 1)),          # bproj
            ],
            out_specs=pl.BlockSpec((BB, C, N), lambda b: (b, 0, 0)),
        ),
        compiler_params=pltpu.CompilerParams(
            dimension_semantics=("parallel",),
            vmem_limit_bytes=64 * 1024 * 1024,
        ),
        cost_estimate=cost,
    )(x_cn, gamma, beta, wqkv, bqkv, wproj, bproj)

    # (B, C, N) -> NCHW: free reshape.
    return out_cn.reshape(B, C, H, W)


def reference_self_attention_2d(x, params, num_heads=4, num_groups=8):
    """Pure-JAX reference matching the PyTorch module exactly (f32, HIGHEST)."""
    B, C, H, W = x.shape
    d = C // num_heads
    gamma, beta = params["gamma"], params["beta"]
    wqkv, bqkv = params["wqkv"], params["bqkv"]        # (3C, C), (3C,)
    wproj, bproj = params["wproj"], params["bproj"]    # (C, C), (C,)

    xg = x.reshape(B, num_groups, C // num_groups, H, W)
    mean = xg.mean(axis=(2, 3, 4), keepdims=True)
    var = xg.var(axis=(2, 3, 4), keepdims=True)
    hn = (xg - mean) / jnp.sqrt(var + GN_EPS)
    hn = hn.reshape(B, C, H, W) * gamma[None, :, None, None] + beta[None, :, None, None]

    qkv = jnp.einsum('oi,bihw->bohw', wqkv, hn, precision=HIGHEST) \
        + bqkv[None, :, None, None]
    q, k, v = jnp.split(qkv, 3, axis=1)
    q = q.reshape(B, num_heads, d, H * W)
    k = k.reshape(B, num_heads, d, H * W)
    v = v.reshape(B, num_heads, d, H * W)
    attn = jnp.einsum('bhcn,bhcm->bhnm', q, k, precision=HIGHEST) / math.sqrt(d)
    attn = jax.nn.softmax(attn, axis=-1)
    out = jnp.einsum('bhnm,bhcm->bhcn', attn, v, precision=HIGHEST)
    out = out.reshape(B, C, H, W)
    out = jnp.einsum('oi,bihw->bohw', wproj, out, precision=HIGHEST) \
        + bproj[None, :, None, None]
    return x + out


if __name__ == "__main__":
    B, C, H, W = 2, 32, 8, 8      # C divisible by num_groups=8 and num_heads=4
    num_heads = 4

    key = jax.random.PRNGKey(0)
    kx, kg, kb, kw1, kb1, kw2, kb2 = jax.random.split(key, 7)

    x = jax.random.normal(kx, (B, C, H, W), jnp.float32)
    params = {
        # GroupNorm affine params
        "gamma": 1.0 + 0.1 * jax.random.normal(kg, (C,), jnp.float32),
        "beta": 0.1 * jax.random.normal(kb, (C,), jnp.float32),
        # 1x1 conv weights stored in conv orientation: (out_ch, in_ch)
        # (== PyTorch conv weight[:, :, 0, 0])
        "wqkv": 0.1 * jax.random.normal(kw1, (3 * C, C), jnp.float32),
        "bqkv": 0.1 * jax.random.normal(kb1, (3 * C,), jnp.float32),
        "wproj": 0.1 * jax.random.normal(kw2, (C, C), jnp.float32),
        "bproj": 0.1 * jax.random.normal(kb2, (C,), jnp.float32),
    }

    y = jax.block_until_ready(self_attention_2d(x, params, num_heads=num_heads))
    y_ref = jax.block_until_ready(reference_self_attention_2d(x, params, num_heads))

    assert y.shape == (B, C, H, W)
    err = jnp.max(jnp.abs(y - y_ref))
    # bf16 MXU operands + f32 accumulation -> a few-e-3 absolute error budget.
    assert jnp.allclose(y, y_ref, atol=5e-3, rtol=5e-3), f"max abs err = {err}"

    print("KERNEL_OK")
</pallas_src>

<mosaic_0001>
module attributes {stable_mosaic.version = 11 : i64} {
  func.func @_self_attn_kernel(%arg0: i32, %arg1: memref<1x32x64xf32, #tpu.memory_space<vmem>>, %arg2: memref<32x1xf32, #tpu.memory_space<vmem>>, %arg3: memref<32x1xf32, #tpu.memory_space<vmem>>, %arg4: memref<96x32xbf16, #tpu.memory_space<vmem>>, %arg5: memref<96x1xf32, #tpu.memory_space<vmem>>, %arg6: memref<32x32xbf16, #tpu.memory_space<vmem>>, %arg7: memref<32x1xf32, #tpu.memory_space<vmem>>, %arg8: memref<1x32x64xf32, #tpu.memory_space<vmem>>) attributes {dimension_semantics = [#tpu.dimension_semantics<parallel>], iteration_bounds = array<i64: 2>, scalar_prefetch = 0 : i64, scratch_operands = 0 : i64, tpu.core_type = #tpu.core_type<tc>, window_params = [{transform_indices = @transform_0, window_bounds = array<i64: 1, 32, 64>}, {pipeline_mode = #tpu.pipeline_mode<synchronous>, transform_indices = @transform_1, window_bounds = array<i64: 32, 1>}, {pipeline_mode = #tpu.pipeline_mode<synchronous>, transform_indices = @transform_2, window_bounds = array<i64: 32, 1>}, {pipeline_mode = #tpu.pipeline_mode<synchronous>, transform_indices = @transform_3, window_bounds = array<i64: 96, 32>}, {pipeline_mode = #tpu.pipeline_mode<synchronous>, transform_indices = @transform_4, window_bounds = array<i64: 96, 1>}, {pipeline_mode = #tpu.pipeline_mode<synchronous>, transform_indices = @transform_5, window_bounds = array<i64: 32, 32>}, {pipeline_mode = #tpu.pipeline_mode<synchronous>, transform_indices = @transform_6, window_bounds = array<i64: 32, 1>}, {transform_indices = @transform_7, window_bounds = array<i64: 1, 32, 64>}]} {
    %c0 = arith.constant 0 : index
    %c0_0 = arith.constant 0 : index
    %0 = vector.load %arg2[%c0, %c0_0] : memref<32x1xf32, #tpu.memory_space<vmem>>, vector<32x1xf32>
    %c0_1 = arith.constant 0 : index
    %c0_2 = arith.constant 0 : index
    %1 = vector.load %arg3[%c0_1, %c0_2] : memref<32x1xf32, #tpu.memory_space<vmem>>, vector<32x1xf32>
    %c0_3 = arith.constant 0 : index
    %c0_4 = arith.constant 0 : index
    %2 = vector.load %arg4[%c0_3, %c0_4] : memref<96x32xbf16, #tpu.memory_space<vmem>>, vector<96x32xbf16>
    %c0_5 = arith.constant 0 : index
    %c0_6 = arith.constant 0 : index
    %3 = vector.load %arg5[%c0_5, %c0_6] : memref<96x1xf32, #tpu.memory_space<vmem>>, vector<96x1xf32>
    %c0_7 = arith.constant 0 : index
    %c0_8 = arith.constant 0 : index
    %4 = vector.load %arg6[%c0_7, %c0_8] : memref<32x32xbf16, #tpu.memory_space<vmem>>, vector<32x32xbf16>
    %c0_9 = arith.constant 0 : index
    %c0_10 = arith.constant 0 : index
    %5 = vector.load %arg7[%c0_9, %c0_10] : memref<32x1xf32, #tpu.memory_space<vmem>>, vector<32x1xf32>
    %6 = tpu.iota {dimensions = array<i32: 0>} : vector<32x8xi32>
    %7 = tpu.iota {dimensions = array<i32: 1>} : vector<32x8xi32>
    %c4_i32 = arith.constant 4 : i32
    %8 = vector.broadcast %c4_i32 : i32 to vector<32x8xi32>
    %9 = arith.muli %7, %8 : vector<32x8xi32>
    %10 = arith.cmpi sge, %6, %9 : vector<32x8xi32>
    %c4_i32_11 = arith.constant 4 : i32
    %11 = vector.broadcast %c4_i32_11 : i32 to vector<32x8xi32>
    %12 = arith.addi %9, %11 : vector<32x8xi32>
    %13 = arith.cmpi slt, %6, %12 : vector<32x8xi32>
    %14 = arith.andi %10, %13 : vector<32x8xi1>
    %15 = arith.extui %14 : vector<32x8xi1> to vector<32x8xi32>
    %16 = arith.sitofp %15 : vector<32x8xi32> to vector<32x8xf32>
    %c0_12 = arith.constant 0 : index
    %c0_13 = arith.constant 0 : index
    %c0_14 = arith.constant 0 : index
    %17 = vector.load %arg1[%c0_12, %c0_13, %c0_14] : memref<1x32x64xf32, #tpu.memory_space<vmem>>, vector<1x32x64xf32>
    %18 = vector.shape_cast %17 : vector<1x32x64xf32> to vector<32x64xf32>
    %cst = arith.constant dense<0.000000e+00> : vector<32xf32>
    %19 = vector.multi_reduction <add>, %18, %cst [1] : vector<32x64xf32> to vector<32xf32>
    %20 = vector.shape_cast %19 : vector<32xf32> to vector<32x1xf32>
    %21 = arith.mulf %18, %18 : vector<32x64xf32>
    %cst_15 = arith.constant dense<0.000000e+00> : vector<32xf32>
    %22 = vector.multi_reduction <add>, %21, %cst_15 [1] : vector<32x64xf32> to vector<32xf32>
    %23 = vector.shape_cast %22 : vector<32xf32> to vector<32x1xf32>
    %24 = vector.broadcast %20 : vector<32x1xf32> to vector<32x8xf32>
    %25 = arith.mulf %24, %16 : vector<32x8xf32>
    %cst_16 = arith.constant dense<0.000000e+00> : vector<8xf32>
    %26 = vector.multi_reduction <add>, %25, %cst_16 [0] : vector<32x8xf32> to vector<8xf32>
    %27 = vector.shape_cast %26 : vector<8xf32> to vector<1x8xf32>
    %28 = vector.broadcast %23 : vector<32x1xf32> to vector<32x8xf32>
    %29 = arith.mulf %28, %16 : vector<32x8xf32>
    %cst_17 = arith.constant dense<0.000000e+00> : vector<8xf32>
    %30 = vector.multi_reduction <add>, %29, %cst_17 [0] : vector<32x8xf32> to vector<8xf32>
    %31 = vector.shape_cast %30 : vector<8xf32> to vector<1x8xf32>
    %cst_18 = arith.constant 3.906250e-03 : f32
    %32 = vector.broadcast %cst_18 : f32 to vector<1x8xf32>
    %33 = arith.mulf %27, %32 : vector<1x8xf32>
    %cst_19 = arith.constant 3.906250e-03 : f32
    %34 = vector.broadcast %cst_19 : f32 to vector<1x8xf32>
    %35 = arith.mulf %31, %34 : vector<1x8xf32>
    %36 = arith.mulf %33, %33 : vector<1x8xf32>
    %37 = arith.subf %35, %36 : vector<1x8xf32>
    %cst_20 = arith.constant 9.99999974E-6 : f32
    %38 = vector.broadcast %cst_20 : f32 to vector<1x8xf32>
    %39 = arith.addf %37, %38 : vector<1x8xf32>
    %40 = math.rsqrt %39 : vector<1x8xf32>
    %41 = vector.broadcast %33 : vector<1x8xf32> to vector<32x8xf32>
    %42 = arith.mulf %16, %41 : vector<32x8xf32>
    %cst_21 = arith.constant dense<0.000000e+00> : vector<32xf32>
    %43 = vector.multi_reduction <add>, %42, %cst_21 [1] : vector<32x8xf32> to vector<32xf32>
    %44 = vector.shape_cast %43 : vector<32xf32> to vector<32x1xf32>
    %45 = vector.broadcast %40 : vector<1x8xf32> to vector<32x8xf32>
    %46 = arith.mulf %16, %45 : vector<32x8xf32>
    %cst_22 = arith.constant dense<0.000000e+00> : vector<32xf32>
    %47 = vector.multi_reduction <add>, %46, %cst_22 [1] : vector<32x8xf32> to vector<32xf32>
    %48 = vector.shape_cast %47 : vector<32xf32> to vector<32x1xf32>
    %49 = arith.mulf %48, %0 : vector<32x1xf32>
    %50 = arith.mulf %44, %49 : vector<32x1xf32>
    %51 = arith.subf %1, %50 : vector<32x1xf32>
    %52 = vector.broadcast %49 : vector<32x1xf32> to vector<32x64xf32>
    %53 = arith.mulf %18, %52 : vector<32x64xf32>
    %54 = vector.broadcast %51 : vector<32x1xf32> to vector<32x64xf32>
    %55 = arith.addf %53, %54 : vector<32x64xf32>
    %56 = arith.truncf %55 : vector<32x64xf32> to vector<32x64xbf16>
    %cst_23 = arith.constant dense<0.000000e+00> : vector<96x64xf32>
    %57 = tpu.matmul %2, %56, %cst_23 {dimension_numbers = #tpu.dot_dimension_numbers<[1], [0], [0], [1], [0, 0, 1, 1], [], []>} : vector<96x32xbf16>, vector<32x64xbf16>, vector<96x64xf32> -> vector<96x64xf32>
    %58 = vector.broadcast %3 : vector<96x1xf32> to vector<96x64xf32>
    %59 = arith.addf %57, %58 : vector<96x64xf32>
    %60 = vector.extract_strided_slice %59 {offsets = [0, 0], sizes = [32, 64], strides = [1, 1]} : vector<96x64xf32> to vector<32x64xf32>
    %61 = vector.shape_cast %60 : vector<32x64xf32> to vector<4x8x64xf32>
    %cst_24 = arith.constant 0.353553385 : f32
    %62 = vector.broadcast %cst_24 : f32 to vector<4x8x64xf32>
    %63 = arith.mulf %61, %62 : vector<4x8x64xf32>
    %64 = vector.extract_strided_slice %59 {offsets = [32, 0], sizes = [32, 64], strides = [1, 1]} : vector<96x64xf32> to vector<32x64xf32>
    %65 = vector.shape_cast %64 : vector<32x64xf32> to vector<4x8x64xf32>
    %66 = vector.extract_strided_slice %59 {offsets = [64, 0], sizes = [32, 64], strides = [1, 1]} : vector<96x64xf32> to vector<32x64xf32>
    %67 = vector.shape_cast %66 : vector<32x64xf32> to vector<4x8x64xf32>
    %68 = tpu.transpose %63, [0, 2, 1] : vector<4x8x64xf32> -> vector<4x64x8xf32>
    %69 = arith.truncf %68 : vector<4x64x8xf32> to vector<4x64x8xbf16>
    %70 = arith.truncf %65 : vector<4x8x64xf32> to vector<4x8x64xbf16>
    %71 = arith.truncf %67 : vector<4x8x64xf32> to vector<4x8x64xbf16>
    %cst_25 = arith.constant dense<0.000000e+00> : vector<4x64x64xf32>
    %72 = tpu.matmul %69, %70, %cst_25 {dimension_numbers = #tpu.dot_dimension_numbers<[2], [1], [1], [2], [0, 0, 0, 1, 1, 2], [0], [0]>} : vector<4x64x8xbf16>, vector<4x8x64xbf16>, vector<4x64x64xf32> -> vector<4x64x64xf32>
    %cst_26 = arith.constant dense<0xFF800000> : vector<4x64xf32>
    %73 = vector.multi_reduction <maximumf>, %72, %cst_26 [2] : vector<4x64x64xf32> to vector<4x64xf32>
    %74 = vector.shape_cast %73 : vector<4x64xf32> to vector<4x64x1xf32>
    %75 = vector.broadcast %74 : vector<4x64x1xf32> to vector<4x64x64xf32>
    %76 = arith.subf %72, %75 : vector<4x64x64xf32>
    %77 = math.exp %76 : vector<4x64x64xf32>
    %cst_27 = arith.constant dense<0.000000e+00> : vector<4x64xf32>
    %78 = vector.multi_reduction <add>, %77, %cst_27 [2] : vector<4x64x64xf32> to vector<4x64xf32>
    %79 = vector.shape_cast %78 : vector<4x64xf32> to vector<4x64x1xf32>
    %80 = tpu.reciprocal %79 {approx = true} : vector<4x64x1xf32> -> vector<4x64x1xf32>
    %81 = vector.broadcast %80 : vector<4x64x1xf32> to vector<4x64x64xf32>
    %82 = arith.mulf %77, %81 : vector<4x64x64xf32>
    %83 = arith.truncf %82 : vector<4x64x64xf32> to vector<4x64x64xbf16>
    %cst_28 = arith.constant dense<0.000000e+00> : vector<4x8x64xf32>
    %84 = tpu.matmul %71, %83, %cst_28 {dimension_numbers = #tpu.dot_dimension_numbers<[2], [2], [1], [1], [0, 0, 0, 1, 1, 1], [0], [0]>} : vector<4x8x64xbf16>, vector<4x64x64xbf16>, vector<4x8x64xf32> -> vector<4x8x64xf32>
    %85 = vector.shape_cast %84 : vector<4x8x64xf32> to vector<32x64xf32>
    %86 = arith.truncf %85 : vector<32x64xf32> to vector<32x64xbf16>
    %cst_29 = arith.constant dense<0.000000e+00> : vector<32x64xf32>
    %87 = tpu.matmul %4, %86, %cst_29 {dimension_numbers = #tpu.dot_dimension_numbers<[1], [0], [0], [1], [0, 0, 1, 1], [], []>} : vector<32x32xbf16>, vector<32x64xbf16>, vector<32x64xf32> -> vector<32x64xf32>
    %88 = arith.addf %18, %87 : vector<32x64xf32>
    %89 = vector.broadcast %5 : vector<32x1xf32> to vector<32x64xf32>
    %90 = arith.addf %88, %89 : vector<32x64xf32>
    %c0_30 = arith.constant 0 : index
    %c0_31 = arith.constant 0 : index
    %c0_32 = arith.constant 0 : index
    %91 = vector.load %arg8[%c0_30, %c0_31, %c0_32] : memref<1x32x64xf32, #tpu.memory_space<vmem>>, vector<1x32x64xf32>
    %92 = vector.shape_cast %91 : vector<1x32x64xf32> to vector<32x64xf32>
    %93 = vector.shape_cast %90 : vector<32x64xf32> to vector<1x32x64xf32>
    tpu.vector_store %arg8[%c0_30, %c0_31, %c0_32], %93 {strides = array<i32>} : memref<1x32x64xf32, #tpu.memory_space<vmem>>, vector<1x32x64xf32>,
    return
  }
  func.func @transform_0(%arg0: i32) -> (i32, i32, i32) {
    %c0_i32 = arith.constant 0 : i32
    %c0_i32_0 = arith.constant 0 : i32
    %c0_i32_1 = arith.constant 0 : i32
    return %arg0, %c0_i32, %c0_i32_0 : i32, i32, i32
  }
  func.func @transform_1(%arg0: i32) -> (i32, i32) {
    %c0_i32 = arith.constant 0 : i32
    %c0_i32_0 = arith.constant 0 : i32
    %c0_i32_1 = arith.constant 0 : i32
    return %c0_i32, %c0_i32_0 : i32, i32
  }
  func.func @transform_2(%arg0: i32) -> (i32, i32) {
    %c0_i32 = arith.constant 0 : i32
    %c0_i32_0 = arith.constant 0 : i32
    %c0_i32_1 = arith.constant 0 : i32
    return %c0_i32, %c0_i32_0 : i32, i32
  }
  func.func @transform_3(%arg0: i32) -> (i32, i32) {
    %c0_i32 = arith.constant 0 : i32
    %c0_i32_0 = arith.constant 0 : i32
    %c0_i32_1 = arith.constant 0 : i32
    return %c0_i32, %c0_i32_0 : i32, i32
  }
  func.func @transform_4(%arg0: i32) -> (i32, i32) {
    %c0_i32 = arith.constant 0 : i32
    %c0_i32_0 = arith.constant 0 : i32
    %c0_i32_1 = arith.constant 0 : i32
    return %c0_i32, %c0_i32_0 : i32, i32
  }
  func.func @transform_5(%arg0: i32) -> (i32, i32) {
    %c0_i32 = arith.constant 0 : i32
    %c0_i32_0 = arith.constant 0 : i32
    %c0_i32_1 = arith.constant 0 : i32
    return %c0_i32, %c0_i32_0 : i32, i32
  }
  func.func @transform_6(%arg0: i32) -> (i32, i32) {
    %c0_i32 = arith.constant 0 : i32
    %c0_i32_0 = arith.constant 0 : i32
    %c0_i32_1 = arith.constant 0 : i32
    return %c0_i32, %c0_i32_0 : i32, i32
  }
  func.func @transform_7(%arg0: i32) -> (i32, i32, i32) {
    %c0_i32 = arith.constant 0 : i32
    %c0_i32_0 = arith.constant 0 : i32
    %c0_i32_1 = arith.constant 0 : i32
    return %arg0, %c0_i32, %c0_i32_0 : i32, i32, i32
  }
}

</mosaic_0001>

<bundles_post_ra>
// kernel: tpu_custom_call.1
= control target key start
LH: loop header
LB: loop body
LE: loop exit
PB: predicated region body
PF: predicated region fallthrough
CT: control target
= control target key end

     0   :  { %12 = vsyncpa [#allocation3], 0  ;;  %s3308_s0 = inlined_call_operand.vmem [shape: f32[2,32,64], index: 0, kind: input, shape index: {}]   ;;  %s3309_s1 = inlined_call_operand.vmem [shape: f32[32,1], index: 1, kind: input, shape index: {}]   ;;  %s3310_s2 = inlined_call_operand.vmem [shape: f32[32,1], index: 2, kind: input, shape index: {}]   ;;  %s3311_s3 = inlined_call_operand.vmem [shape: bf16[96,32], index: 3, kind: input, shape index: {}]   ;;  %s3312_s4 = inlined_call_operand.vmem [shape: f32[96,1], index: 4, kind: input, shape index: {}]   ;;  %s3313_s5 = inlined_call_operand.vmem [shape: bf16[32,32], index: 5, kind: input, shape index: {}]   ;;  %s3314_s6 = inlined_call_operand.vmem [shape: f32[32,1], index: 6, kind: input, shape index: {}]   ;;  %s3315_s7 = inlined_call_operand.hbm [shape: f32[2,32,64], index: 7, kind: output, shape index: {}]  }
   0x1   :  { %14 = vsyncpa [#allocation3 + $0x1], 0  ;;  %s2547_s24 = smov 0   ;;  %s2549_s25 = smov 0  }
   0x2   :  { %s2551_s26 = smov 0   ;;  %s2553_s27 = smov 0  }
   0x3 LB: > { %s2568_s28 = sadd.s32 4294967295, %s2499_s27   ;;  %s1945_s29 = sadd.s32 4294967294, %s2499_s27   ;;  %s2499_s27 = sphi %s2553_s27, %s3326_s27   ;;  %s2495_s26 = sphi %s2551_s26, %s3325_s26   ;;  %s2491_s25 = sphi %s2549_s25, %s3324_s25   ;;  %s2487_s24 = sphi %s2547_s24, %s3323_s24  }
   0x4   : > { %s2572_s30 = sadd.s32 1, %s2499_s27   ;;  %s179_s8 = sadd.s32 1, %s2495_s26 }
   0x5   : > { %s176_s9 = ssub.s32 %s2499_s27, %s2572_s30  ;;  %p189_p0 = scmp.ne.s32.totalorder %s2495_s26, %s2491_s25 }
   0x6   : > { %p177_p1 = scmp.eq.s32.totalorder %s176_s9, 0  ;;  %p190_p2 = scmp.eq.s32.totalorder %s2568_s28, 1 }
   0x7   : > { %p195_p3 = scmp.ne.s32.totalorder %s2491_s25, %s2487_s24  ;;  %p196_p4 = scmp.eq.s32.totalorder %s1945_s29, 1 }
   0x8   : > { %s2583_s10 = scalar_select %p177_p1, %s2495_s26, %s179_s8  }
   0x9   : > { %p2585_p5 = por %p190_p2, %p189_p0  ;;  %p2589_p6 = por %p196_p4, %p195_p3 }
   0xa   : > { %p1948_p7 = scmp.ge.s32.totalorder %s2499_s27, 1  ;;  %p240_p8 = scmp.lt.s32.totalorder %s2499_s27, 3 }
   0xc   : > { %p241_p9 = pnand %p1948_p7, %p240_p8 }
   0xe   : > { %244 = sbr.rel (%p241_p9) target bundleno = 1955 (0x7a3), region = 48 }
  0x13   : > { %p272_p10 = scmp.lt.s32.totalorder %s2568_s28, 1  ;;  %vm351_vm0 = vcmask 523264   ;;  %v318_v16 = vlaneseq  ;;  %v3316_v25 = vmov 0.0   ;;  %vm384_vm13 = vcmask 64512   ;;  %s269_s16 = sand.u32 1, %s2491_s25  }
  0x14   : > { %vm605_vm14 = vcmask 261120   ;;  %vm873_vm15 = vcmask 1043456   ;;  %s1949_s18 = sshll.u32 %s269_s16, 5  ;;  %s1998_s21 = sshll.u32 %s2568_s28, 9 }
  0x15   : > { %s273_s13 = scalar_select %p272_p10, %s2568_s28, 1  ;;  %v324_v17 = vand.u32 127, %v318_v16  ;;  %v319_v19 = vshrl.u32 %v318_v16, 7 }
  0x16   : > { %s271_s19 = scalar_lea.vmem [#allocation2], %s1949_s18  ;;  %s3260_s29 = scalar_lea.hbm %s3315_s7, %s1998_s21 }
  0x17   : > { %s1997_s14 = sshll.u32 %s273_s13, 5  ;;  %v325_v18 = vmul.u32 4, %v324_v17  ;;  %v321_v21 = vadd.s32 16, %v319_v19  ;;  %v320_v22 = vadd.s32 8, %v319_v19  ;;  %v322_v23 = vadd.s32 24, %v319_v19  ;;  %s1883_s20 = sshll.u32 %s271_s19, 4  ;;  %s3262_s20 = int_to_ptr.vmem [resolvable:$true] %s1883_s20 }
  0x18   : > { %s2600_s17 = scalar_lea.vmem %s3308_s0, %s1997_s14  ;;  %s3268_s28 = scalar_lea.sflag [#allocation3], %s269_s16 }
  0x19   : > { %v2603_v0 = vld [vmem:[%s2600_s17 + $0x10] sm:$0xff]  ;;  %v2606_v1 = vld [vmem:[%s2600_s17] sm:$0xff]  ;;  %v2609_v2 = vld [vmem:[%s2600_s17 + $0x18] sm:$0xff]  ;;  %v330_v20 = vadd.s32 4, %v325_v18  ;;  %vm326_vm1 = vcmp.ge.s32.totalorder %v319_v19, %v325_v18  ;;  %vm328_vm3 = vcmp.ge.s32.totalorder %v321_v21, %v325_v18  ;;  %vm327_vm5 = vcmp.ge.s32.totalorder %v320_v22, %v325_v18  ;;  %s2504_s8 = smov [#allocation2]  }
  0x1a   : > { %v358_v3 = vsel %vm351_vm0, %v2603_v0, 0.0  ;;  %v352_v4 = vsel %vm351_vm0, %v2606_v1, 0.0  ;;  %v2616_v5 = vld [vmem:[%s2600_s17 + $0x8] sm:$0xff]  ;;  %v361_v6 = vsel %vm351_vm0, %v2609_v2, 0.0  ;;  %v364_v8 = vmul.f32 %v2606_v1, %v2606_v1  ;;  %s2443_s9 = sshll.u32 %s2504_s8, 4  ;;  %s2444_s9 = int_to_ptr.vmem [resolvable:$false] %s2443_s9 }
  0x1b   : > { %359 = vadd.xlane.f32.xlu1 %v358_v3  ;;  %353 = vadd.xlane.f32.xlu0 %v352_v4  ;;  %v355_v7 = vsel %vm351_vm0, %v2616_v5, 0.0  ;;  %v365_v9 = vmul.f32 %v2616_v5, %v2616_v5  ;;  %v366_v12 = vmul.f32 %v2603_v0, %v2603_v0  ;;  %v367_v13 = vmul.f32 %v2609_v2, %v2609_v2  ;;  %s2445_s13 = scalar_lea.vmem %s2444_s9, 1024  ;;  %p2446_p0 = scmp.lt.s32.totalorder %s3262_s20, %s2444_s9 }
  0x1c   : > { %v368_v10 = vsel %vm351_vm0, %v364_v8, 0.0  ;;  %vm331_vm2 = vcmp.lt.s32.totalorder %v319_v19, %v330_v20  ;;  %vm333_vm4 = vcmp.lt.s32.totalorder %v321_v21, %v330_v20  ;;  %vm332_vm6 = vcmp.lt.s32.totalorder %v320_v22, %v330_v20 }
  0x1d   : > { %v371_v11 = vsel %vm351_vm0, %v365_v9, 0.0  ;;  %v374_v14 = vsel %vm351_vm0, %v366_v12, 0.0  ;;  %v377_v15 = vsel %vm351_vm0, %v367_v13, 0.0  ;;  %vm335_vm7 = vmand %vm326_vm1, %vm331_vm2  ;;  %vm329_vm9 = vcmp.ge.s32.totalorder %v322_v23, %v325_v18 }
  0x1e   : > { %vm337_vm8 = vmand %vm328_vm3, %vm333_vm4  ;;  %vm334_vm10 = vcmp.lt.s32.totalorder %v322_v23, %v330_v20  ;;  %v2635_v26 = vsel %vm335_vm7, 1.0, %v3316_v25  ;;  %vm2503_vm1 = vmmov 0  }
  0x1f   : > { %362 = vadd.xlane.f32.xlu1 %v361_v6  ;;  %356 = vadd.xlane.f32.xlu0 %v355_v7  ;;  %vm336_vm11 = vmand %vm327_vm5, %vm332_vm6  ;;  %v1954_v28 = vsel %vm337_vm8, 1.0, %v3316_v25 }
  0x20   : > { %vm338_vm12 = vmand %vm329_vm9, %vm334_vm10  ;;  %v2639_v29 = vsel %vm336_vm11, 1.0, %v3316_v25 }
  0x21   : > { %v1955_v31 = vsel %vm338_vm12, 1.0, %v3316_v25 }
  0x23   : > { %369 = vadd.xlane.f32.xlu1 %v368_v10  ;;  %372 = vadd.xlane.f32.xlu0 %v371_v11 }
  0x27   : > { %375 = vadd.xlane.f32.xlu0 %v374_v14  ;;  %378 = vadd.xlane.f32.xlu1 %v377_v15 }
  0xa4   : > { %v360_v24 = vpop.xlane.xlu1 %359  ;;  %v354_v27 = vpop.xlane.xlu0 %353 }
  0xa5   : > { %v380_v30 = vmul.f32 %v2635_v26, %v354_v27  ;;  %v382_v34 = vmul.f32 %v1954_v28, %v360_v24 }
  0xa7   : > { %v385_v36 = vsel %vm384_vm13, %v380_v30, 0.0  ;;  %v388_v42 = vsel %vm384_vm13, %v382_v34, 0.0 }
  0xa8   : > { %v363_v32 = vpop.xlane.xlu1 %362  ;;  %v357_v33 = vpop.xlane.xlu0 %356 }
  0xa9   : > { %v381_v35 = vmul.f32 %v2639_v29, %v357_v33  ;;  %v383_v37 = vmul.f32 %v1955_v31, %v363_v32 }
  0xab   : > { %v386_v38 = vsel %vm384_vm13, %v381_v35, 0.0  ;;  %v390_v46 = vsel %vm384_vm13, %v383_v37, 0.0 }
  0xac   : > { %v387_v39 = vadd.f32 %v386_v38, %v385_v36  ;;  %v370_v40 = vpop.xlane.xlu1 %369  ;;  %v373_v41 = vpop.xlane.xlu0 %372  ;;  %v2502_v36 = vmov 0  }
  0xad   : > { %v398_v43 = vmul.f32 %v2635_v26, %v370_v40  ;;  %v399_v44 = vmul.f32 %v2639_v29, %v373_v41  ;;  %2212 = vset.pattern.permute.xlu1 %v2502_v36  ;;  %2211 = vset.pattern.permute.xlu0 %v2502_v36 }
  0xae   : > { %v389_v45 = vadd.f32 %v388_v42, %v387_v39  ;;  %v281_v39 = vld [vmem:[%s3309_s1 + $0x18] sm:$0xff] }
  0xaf   : > { %v402_v47 = vsel %vm384_vm13, %v398_v43, 0.0  ;;  %v403_v48 = vsel %vm384_vm13, %v399_v44, 0.0  ;;  %v278_v43 = vld [vmem:[%s3309_s1] sm:$0xff] }
  0xb0   : > { %v391_v49 = vadd.f32 %v390_v46, %v389_v45  ;;  %v376_v50 = vpop.xlane.xlu0 %375  ;;  %v379_v51 = vpop.xlane.xlu1 %378  ;;  %v404_v55 = vadd.f32 %v403_v48, %v402_v47  ;;  %v299_v45 = vld [vmem:[%s3312_s4 + $0x8] sm:$0xff] }
  0xb1   : > { %v400_v52 = vmul.f32 %v1954_v28, %v376_v50  ;;  %v401_v53 = vmul.f32 %v1955_v31, %v379_v51  ;;  %v279_v47 = vld [vmem:[%s3309_s1 + $0x8] sm:$0xff] }
  0xb2   : > { %v392_v54 = vrot.slane %v391_v49, 4 }
  0xb3   : > { %v405_v56 = vsel %vm384_vm13, %v400_v52, 0.0  ;;  %v407_v57 = vsel %vm384_vm13, %v401_v53, 0.0  ;;  %v284_v52 = vld [vmem:[%s3310_s2 + $0x10] sm:$0xff]  ;;  %v303_v53 = vld [vmem:[%s3312_s4 + $0x28] sm:$0xff] }
  0xb4   : > { %v393_v58 = vadd.f32 %v392_v54, %v391_v49  ;;  %v406_v59 = vadd.f32 %v405_v56, %v404_v55  ;;  %v300_v49 = vld [vmem:[%s3312_s4 + $0x10] sm:$0xff] }
  0xb6   : > { %v394_v60 = vrot.slane %v393_v58, 2  ;;  %v408_v61 = vadd.f32 %v407_v57, %v406_v59  ;;  %v285_v57 = vld [vmem:[%s3310_s2 + $0x18] sm:$0xff] }
  0xb8   : > { %v395_v62 = vadd.f32 %v394_v60, %v393_v58  ;;  %v409_v63 = vrot.slane %v408_v61, 4  ;;  %v304_v58 = vld [vmem:[%s3312_s4 + $0x30] sm:$0xff] }
  0xba   : > { %v396_v3 = vrot.slane %v395_v62, 1  ;;  %v410_v4 = vadd.f32 %v409_v63, %v408_v61  ;;  %v305_v63 = vld [vmem:[%s3312_s4 + $0x38] sm:$0xff] }
  0xbc   : > { %v397_v6 = vadd.f32 %v396_v3, %v395_v62  ;;  %v411_v7 = vrot.slane %v410_v4, 2  ;;  %v282_v62 = vld [vmem:[%s3310_s2] sm:$0xff] }
  0xbe   : > { %v415_v8 = vmul.f32 0.00390625, %v397_v6  ;;  %v412_v9 = vadd.f32 %v411_v7, %v410_v4  ;;  %v283_v6 = vld [vmem:[%s3310_s2 + $0x8] sm:$0xff] }
  0xc0   : > { %v413_v10 = vrot.slane %v412_v9, 1  ;;  %v424_v11 = vmul.f32 %v1955_v31, %v415_v8  ;;  %v423_v12 = vmul.f32 %v1954_v28, %v415_v8  ;;  %v417_v17 = vmul.f32 %v415_v8, %v415_v8 }
  0xc1   : > { %v422_v34 = vmul.f32 %v2639_v29, %v415_v8  ;;  %v421_v35 = vmul.f32 %v2635_v26, %v415_v8  ;;  %v298_v8 = vld [vmem:[%s3312_s4] sm:$0xff] }
  0xc2   : > { %v414_v13 = vadd.f32 %v413_v10, %v412_v9  ;;  %v434_v14 = vsel %vm384_vm13, %v424_v11, 0.0  ;;  %v431_v15 = vsel %vm384_vm13, %v423_v12, 0.0  ;;  %v2297_v9 = vld [vmem:[%s3311_s3] sm:$0xff]   ;;  %v301_v11 = vld [vmem:[%s3312_s4 + $0x18] sm:$0xff] }
  0xc3   : > { %435 = vadd.xlane.f32.xlu1 %v434_v14  ;;  %432 = vadd.xlane.f32.xlu0 %v431_v15  ;;  %v302_v10 = vld [vmem:[%s3312_s4 + $0x20] sm:$0xff] }
  0xc4   : > { %v416_v16 = vmul.f32 0.00390625, %v414_v13  ;;  %2055 = vmatprep.mubr.msk.bf16.mxu0 %vm605_vm14, %v2297_v9 }
  0xc6   : > { %v418_v18 = vsub.f32 %v416_v16, %v417_v17 }
  0xc8   : > { %v419_v19 = vadd.f32 1e-05, %v418_v18 }
  0xca   : > { %2305 = vrsqrt.f32 %v419_v19 }
  0xd7   : > { %v2306_v20 = vpop.eup %2305 }
  0xd8   : > { %v440_v21 = vmul.f32 %v2306_v20, %v1955_v31  ;;  %v439_v22 = vmul.f32 %v2306_v20, %v1954_v28  ;;  %v438_v27 = vmul.f32 %v2306_v20, %v2639_v29  ;;  %v437_v30 = vmul.f32 %v2306_v20, %v2635_v26  ;;  %v280_v26 = vld [vmem:[%s3309_s1 + $0x10] sm:$0xff] }
  0xd9   : > { %v428_v28 = vsel %vm384_vm13, %v422_v34, 0.0  ;;  %v425_v31 = vsel %vm384_vm13, %v421_v35, 0.0 }
  0xda   : > { %v450_v23 = vsel %vm384_vm13, %v440_v21, 0.0  ;;  %v447_v24 = vsel %vm384_vm13, %v439_v22, 0.0  ;;  %v444_v32 = vsel %vm384_vm13, %v438_v27, 0.0  ;;  %v441_v33 = vsel %vm384_vm13, %v437_v30, 0.0 }
  0xdb   : > { %451 = vadd.xlane.f32.xlu1 %v450_v23  ;;  %448 = vadd.xlane.f32.xlu0 %v447_v24 }
  0xdf   : > { %445 = vadd.xlane.f32.xlu1 %v444_v32  ;;  %442 = vadd.xlane.f32.xlu0 %v441_v33 }
  0xe3   : > { %429 = vadd.xlane.f32.xlu1 %v428_v28  ;;  %426 = vadd.xlane.f32.xlu0 %v425_v31 }
 0x14c   : > { %v436_v37 = vpop.xlane.xlu1 %435  ;;  %v433_v38 = vpop.xlane.xlu0 %432 }
 0x164   : > { %v452_v29 = vpop.xlane.xlu1 %451  ;;  %v449_v40 = vpop.xlane.xlu0 %448 }
 0x165   : > { %v456_v41 = vmul.f32 %v452_v29, %v281_v39  ;;  %v455_v42 = vmul.f32 %v449_v40, %v280_v26 }
 0x167   : > { %482 = vperm.xlu1 %2212, %v456_v41   ;;  %477 = vperm.xlu0 %2211, %v455_v42   ;;  %v459_v50 = vmul.f32 %v455_v42, %v433_v38  ;;  %v460_v54 = vmul.f32 %v456_v41, %v436_v37 }
 0x168   : > { %v443_v44 = vpop.xlane.xlu0 %442  ;;  %v446_v48 = vpop.xlane.xlu1 %445 }
 0x169   : > { %v453_v46 = vmul.f32 %v443_v44, %v278_v43  ;;  %v454_v51 = vmul.f32 %v446_v48, %v279_v47  ;;  %v463_v55 = vsub.f32 %v284_v52, %v459_v50  ;;  %v464_v60 = vsub.f32 %v285_v57, %v460_v54 }
 0x16b   : > { %522 = vperm.xlu0 %2211, %v299_v45   ;;  %467 = vperm.xlu1 %2212, %v453_v46  }
 0x16c   : > { %v427_v56 = vpop.xlane.xlu0 %426  ;;  %v430_v61 = vpop.xlane.xlu1 %429 }
 0x16d   : > { %v457_v59 = vmul.f32 %v453_v46, %v427_v56  ;;  %v458_v3 = vmul.f32 %v454_v51, %v430_v61  ;;  %v2302_v61 = vld [vmem:[%s3311_s3 + $0x28] sm:$0xff]  }
 0x16f   : > { %527 = vperm.xlu0 %2211, %v300_v49   ;;  %472 = vperm.xlu1 %2212, %v454_v51   ;;  %v461_v4 = vsub.f32 %v282_v62, %v457_v59  ;;  %v462_v7 = vsub.f32 %v283_v6, %v458_v3  ;;  %v2301_v59 = vld [vmem:[%s3311_s3 + $0x20] sm:$0xff]  }
 0x173   : > { %542 = vperm.xlu0 %2211, %v303_v53   ;;  %501 = vperm.xlu1 %2212, %v463_v55  }
 0x177   : > { %547 = vperm.xlu0 %2211, %v304_v58   ;;  %506 = vperm.xlu1 %2212, %v464_v60  }
 0x17b   : > { %552 = vperm.xlu0 %2211, %v305_v63   ;;  %491 = vperm.xlu1 %2212, %v461_v4  }
 0x17f   : > { %496 = vperm.xlu1 %2212, %v462_v7  }
 0x183   : > { %517 = vperm.xlu1 %2212, %v298_v8  }
 0x187   : > { %537 = vperm.xlu1 %2212, %v302_v10  }
 0x18b   : > { %532 = vperm.xlu1 %2212, %v301_v11  }
 0x1e2   : > { %v483_v12 = vpop.permute.xlu1 %482  ;;  %v478_v15 = vpop.permute.xlu0 %477 }
 0x1e3   : > { %v488_v17 = vmul.f32 %v483_v12, %v2609_v2  ;;  %v487_v18 = vmul.f32 %v478_v15, %v2603_v0  ;;  %v2298_v0 = vld [vmem:[%s3311_s3 + $0x8] sm:$0xff]   ;;  %v2299_v2 = vld [vmem:[%s3311_s3 + $0x10] sm:$0xff]  }
 0x1e6   : > { %v468_v13 = vpop.permute.xlu1 %467 }
 0x1e7   : > { %v485_v24 = vmul.f32 %v468_v13, %v2606_v1  ;;  %v2300_v1 = vld [vmem:[%s3311_s3 + $0x18] sm:$0xff]  }
 0x1ea   : > { %v473_v14 = vpop.permute.xlu1 %472 }
 0x1eb   : > { %v486_v27 = vmul.f32 %v473_v14, %v2616_v5  ;;  %v523_v5 = vpop.permute.xlu0 %522 }
 0x1ee   : > { %v502_v16 = vpop.permute.xlu1 %501 }
 0x1ef   : > { %v511_v20 = vadd.f32 %v502_v16, %v487_v18  ;;  %v528_v28 = vpop.permute.xlu0 %527 }
 0x1f2   : > { %v507_v19 = vpop.permute.xlu1 %506 }
 0x1f3   : > { %v512_v21 = vadd.f32 %v507_v19, %v488_v17  ;;  %v543_v37 = vpop.permute.xlu0 %542 }
 0x1f5   : > { %v514_v22 = vpack.c.bf16 %v512_v21, %v511_v20 }
 0x1f6   : > { %v492_v23 = vpop.permute.xlu1 %491 }
 0x1f7   : > { %2051 = vmatprep.subr.bf16.mxu0 %v514_v22  ;;  %v509_v32 = vadd.f32 %v492_v23, %v485_v24  ;;  %v548_v46 = vpop.permute.xlu0 %547 }
 0x1f8   : > { %2052 = vmatpush3.bf16.msra.mxu0 %v514_v22 }
 0x1fa   : > { %v497_v30 = vpop.permute.xlu1 %496 }
 0x1fb   : > { %v510_v33 = vadd.f32 %v497_v30, %v486_v27  ;;  %v553_v4 = vpop.permute.xlu0 %552 }
 0x1fd   : > { %v513_v34 = vpack.c.bf16 %v510_v33, %v509_v32 }
 0x1fe   : > { %v518_v35 = vpop.permute.xlu1 %517 }
 0x1ff   : > { %2053 = vmatprep.subr.bf16.mxu0 %v513_v34 }
 0x200   : > { %2054 = vmatpush3.bf16.msra.mxu0 %v513_v34 }
 0x202   : > { %v538_v31 = vpop.permute.xlu1 %537 }
 0x203   : > { %2056 = vmatmul.mubr.msk.bf16.vlgmr.msra.gmra.mxu0 %vm605_vm14, %v2298_v0 }
 0x204   : > { %2059 = vmatprep.mubr.msk.bf16.mxu0 %vm605_vm14, %v2299_v2 }
 0x206   : > { %v533_v26 = vpop.permute.xlu1 %532 }
 0x20b   : > { %2060 = vmatmul.mubr.msk.bf16.gmra.mxu0 %vm605_vm14, %v2300_v1 }
 0x20c   : > { %2063 = vmatprep.mubr.msk.bf16.mxu0 %vm605_vm14, %v2301_v59 }
 0x213   : > { %2064 = vmatmul.mubr.msk.bf16.gmra.mxu0 %vm605_vm14, %v2302_v61 }
 0x2c3   : > { %v2057_v36 = vpop.f32.mrf.mxu0 }
 0x2c4   : > { %v667_v39 = vadd.f32 %v2057_v36, %v528_v28 }
 0x2c5   : > { %v658_v38 = vpop.f32.mrf.mxu0 }
 0x2c6   : > { %v659_v40 = vadd.f32 %v658_v38, %v518_v35  ;;  %v707_v43 = vmul.f32 0.35355338, %v667_v39 }
 0x2c7   : > { %v2058_v29 = vpop.f32.mrf.mxu0 }
 0x2c8   : > { %v670_v41 = vadd.f32 %v2058_v29, %v533_v26  ;;  %v705_v48 = vmul.f32 0.35355338, %v659_v40 }
 0x2c9   : > { %v661_v42 = vpop.f32.mrf.mxu0 }
 0x2ca   : > { %v708_v44 = vmul.f32 0.35355338, %v670_v41  ;;  %v662_v45 = vadd.f32 %v661_v42, %v523_v5 }
 0x2cb   : > { %v2061_v47 = vpop.f32.mrf.mxu0 }
 0x2cc   : > { %v2255_v49 = vpack.i.bf16 %v708_v44, %v707_v43  ;;  %v706_v50 = vmul.f32 0.35355338, %v662_v45  ;;  %v683_v51 = vadd.f32 %v2061_v47, %v548_v46 }
 0x2cd   : > { %v674_v52 = vpop.f32.mrf.mxu0 }
 0x2ce   : > { %v2213_v53 = vpack.i.bf16 %v706_v50, %v705_v48  ;;  %v855_v54 = vpack.c.bf16 %v683_v51, %v683_v51  ;;  %v675_v55 = vadd.f32 %v674_v52, %v538_v31  ;;  %2256 = vxpose.xlu0.b32.start.end [1/1] (short) (narrow) %v2255_v49, 64 }
 0x2cf   : > { %v2062_v56 = vpop.f32.mrf.mxu0 }
 0x2d0   : > { %v1035_v57 = vsel %vm873_vm15, %v855_v54, 0  ;;  %v853_v58 = vpack.c.bf16 %v675_v55, %v675_v55  ;;  %2214 = vxpose.xlu1.b32.start.end [1/1] (short) (narrow) %v2213_v53, 64  ;;  %2165 = vmatprep.subr.msk.bf16.mxu0 %vm873_vm15, %v855_v54  ;;  %v686_v23 = vadd.f32 %v2062_v56, %v553_v4 }
 0x2d1   : > { %v677_v60 = vpop.f32.mrf.mxu0  ;;  %2088 = vmatpush3.bf16.msra.mxu0 %v1035_v57 }
 0x2d2   : > { %v678_v62 = vadd.f32 %v677_v60, %v543_v37  ;;  %2163 = vmatprep.subr.msk.bf16.mxu1 %vm873_vm15, %v853_v58  ;;  %v875_v63 = vsel %vm873_vm15, %v853_v58, 0  ;;  %2107 = vmatprep.subr.bf16.mxu0 %v3316_v25  ;;  %v856_v34 = vpack.c.bf16 %v686_v23, %v686_v23 }
 0x2d3   : > { %2068 = vmatpush3.bf16.msra.mxu1 %v875_v63 }
 0x2d4   : > { %v854_v3 = vpack.c.bf16 %v678_v62, %v678_v62  ;;  %v1115_v55 = vsel %vm873_vm15, %v856_v34, 0 }
 0x2d6   : > { %2164 = vmatprep.subr.msk.bf16.mxu1 %vm873_vm15, %v854_v3  ;;  %v955_v0 = vsel %vm873_vm15, %v854_v3, 0 }
 0x34a   : > { %v2748_v6 = vpop.trf.xlu0 }
 0x34b   : > { %v2258_v9 = vunpack.i.l.bf16 %v2748_v6  ;;  %v2261_v59 = vunpack.i.h.bf16 %v2748_v6 }
 0x34c   : > { %v2215_v7 = vpop.trf.xlu1 }
 0x34d   : > { %v2216_v15 = vunpack.i.l.bf16 %v2215_v7  ;;  %v2219_v45 = vunpack.i.h.bf16 %v2215_v7 }
 0x34e   : > { %v2750_v8 = vpop.trf.xlu0 }
 0x34f   : > { %v2263_v10 = vunpack.i.l.bf16 %v2750_v8  ;;  %v2266_v57 = vunpack.i.h.bf16 %v2750_v8 }
 0x350   : > { %v2220_v11 = vpop.trf.xlu1 }
 0x351   : > { %v845_v12 = vpack.c.bf16 %v2263_v10, %v2258_v9  ;;  %v2221_v14 = vunpack.i.l.bf16 %v2220_v11  ;;  %v2224_v40 = vunpack.i.h.bf16 %v2220_v11  ;;  %v849_v61 = vpack.c.bf16 %v2266_v57, %v2261_v59  ;;  %v2784_v11 = vpop.f32.mrf.mxu0 }
 0x352   : > { %v2754_v13 = vpop.trf.xlu0 }
 0x353   : > { %2089 = vmatprep.mubr.msk.bf16.mxu0 %vm384_vm13, %v845_v12  ;;  %v837_v17 = vpack.c.bf16 %v2221_v14, %v2216_v15  ;;  %v2268_v19 = vunpack.i.l.bf16 %v2754_v13  ;;  %v841_v48 = vpack.c.bf16 %v2224_v40, %v2219_v45  ;;  %v2271_v3 = vunpack.i.h.bf16 %v2754_v13  ;;  %v2786_v12 = vpop.f32.mrf.mxu0 }
 0x354   : > { %v2225_v16 = vpop.trf.xlu1 }
 0x355   : > { %2069 = vmatprep.mubr.msk.bf16.mxu1 %vm384_vm13, %v837_v17  ;;  %v2226_v24 = vunpack.i.l.bf16 %v2225_v16  ;;  %v2229_v51 = vunpack.i.h.bf16 %v2225_v16  ;;  %v2788_v14 = vpop.f32.mrf.mxu0 }
 0x356   : > { %v2758_v18 = vpop.trf.xlu0  ;;  %3320 = vst [vmem:[#allocation5_spill] sm:$0xff] %v2788_v14 }
 0x357   : > { %v2273_v20 = vunpack.i.l.bf16 %v2758_v18  ;;  %v2276_v62 = vunpack.i.h.bf16 %v2758_v18  ;;  %v2790_v15 = vpop.f32.mrf.mxu0 }
 0x358   : > { %v2230_v21 = vpop.trf.xlu1 }
 0x359   : > { %v846_v22 = vpack.c.bf16 %v2273_v20, %v2268_v19  ;;  %v2231_v27 = vunpack.i.l.bf16 %v2230_v21  ;;  %v2234_v49 = vunpack.i.h.bf16 %v2230_v21  ;;  %v850_v7 = vpack.c.bf16 %v2276_v62, %v2271_v3 }
 0x35a   : > { %v2277_v30 = vpop.trf.xlu0 }
 0x35b   : > { %2090 = vmatmul.mubr.msk.bf16.vlgmr.msra.gmra.mxu0 %vm384_vm13, %v846_v22  ;;  %v838_v33 = vpack.c.bf16 %v2231_v27, %v2226_v24  ;;  %v2278_v5 = vunpack.i.l.bf16 %v2277_v30  ;;  %v842_v53 = vpack.c.bf16 %v2234_v49, %v2229_v51  ;;  %v2281_v4 = vunpack.i.h.bf16 %v2277_v30 }
 0x35c   : > { %v2235_v32 = vpop.trf.xlu1 }
 0x35d   : > { %2070 = vmatmul.mubr.msk.bf16.vlgmr.msra.gmra.mxu1 %vm384_vm13, %v838_v33  ;;  %v2236_v31 = vunpack.i.l.bf16 %v2235_v32  ;;  %v2239_v52 = vunpack.i.h.bf16 %v2235_v32 }
 0x35e   : > { %v2282_v2 = vpop.trf.xlu0  ;;  %2078 = vmatpush3.bf16.msra.mxu1 %v955_v0 }
 0x35f   : > { %v2283_v1 = vunpack.i.l.bf16 %v2282_v2  ;;  %2166 = vmatprep.subr.msk.bf16.mxu1 %vm873_vm15, %v856_v34  ;;  %v2286_v63 = vunpack.i.h.bf16 %v2282_v2 }
 0x360   : > { %v2240_v35 = vpop.trf.xlu1 }
 0x361   : > { %v2241_v28 = vunpack.i.l.bf16 %v2240_v35  ;;  %v847_v37 = vpack.c.bf16 %v2283_v1, %v2278_v5  ;;  %v2244_v50 = vunpack.i.h.bf16 %v2240_v35  ;;  %v851_v9 = vpack.c.bf16 %v2286_v63, %v2281_v4 }
 0x362   : > { %v2287_v36 = vpop.trf.xlu0 }
 0x363   : > { %2093 = vmatprep.mubr.msk.bf16.mxu0 %vm384_vm13, %v847_v37  ;;  %v839_v39 = vpack.c.bf16 %v2241_v28, %v2236_v31  ;;  %v2288_v41 = vunpack.i.l.bf16 %v2287_v36  ;;  %v843_v54 = vpack.c.bf16 %v2244_v50, %v2239_v52  ;;  %v2291_v6 = vunpack.i.h.bf16 %v2287_v36 }
 0x364   : > { %v2245_v38 = vpop.trf.xlu1 }
 0x365   : > { %2073 = vmatprep.mubr.msk.bf16.mxu1 %vm384_vm13, %v839_v39  ;;  %v2246_v43 = vunpack.i.l.bf16 %v2245_v38  ;;  %v2249_v58 = vunpack.i.h.bf16 %v2245_v38 }
 0x366   : > { %v2292_v26 = vpop.trf.xlu0 }
 0x367   : > { %v2293_v29 = vunpack.i.l.bf16 %v2292_v26  ;;  %v2296_v8 = vunpack.i.h.bf16 %v2292_v26 }
 0x368   : > { %v2250_v42 = vpop.trf.xlu1 }
 0x369   : > { %v2251_v44 = vunpack.i.l.bf16 %v2250_v42  ;;  %v848_v46 = vpack.c.bf16 %v2293_v29, %v2288_v41  ;;  %v2254_v56 = vunpack.i.h.bf16 %v2250_v42  ;;  %v852_v10 = vpack.c.bf16 %v2296_v8, %v2291_v6 }
 0x36b   : > { %v840_v47 = vpack.c.bf16 %v2251_v44, %v2246_v43  ;;  %2094 = vmatmul.mubr.msk.bf16.gmra.mxu0 %vm384_vm13, %v848_v46  ;;  %v844_v60 = vpack.c.bf16 %v2254_v56, %v2249_v58 }
 0x36d   : > { %2074 = vmatmul.mubr.msk.bf16.gmra.mxu1 %vm384_vm13, %v840_v47 }
 0x36e   : > { %2079 = vmatprep.mubr.msk.bf16.mxu1 %vm384_vm13, %v841_v48 }
 0x375   : > { %2080 = vmatmul.mubr.msk.bf16.vlgmr.msra.gmra.mxu1 %vm384_vm13, %v842_v53 }
 0x376   : > { %2098 = vmatpush3.bf16.msra.mxu1 %v1115_v55  ;;  %2083 = vmatprep.mubr.msk.bf16.mxu1 %vm384_vm13, %v843_v54 }
 0x377   : > { %2119 = vmatprep.subr.bf16.mxu1 %v3316_v25 }
 0x37d   : > { %2084 = vmatmul.mubr.msk.bf16.gmra.mxu1 %vm384_vm13, %v844_v60 }
 0x37e   : > { %2099 = vmatprep.mubr.msk.bf16.mxu1 %vm384_vm13, %v849_v61 }
 0x385   : > { %2100 = vmatmul.mubr.msk.bf16.vlgmr.msra.gmra.mxu1 %vm384_vm13, %v850_v7 }
 0x386   : > { %2103 = vmatprep.mubr.msk.bf16.mxu1 %vm384_vm13, %v851_v9 }
 0x38d   : > { %2104 = vmatmul.mubr.msk.bf16.gmra.mxu1 %vm384_vm13, %v852_v10 }
 0x41b   : > { %v2792_v13 = vpop.f32.mrf.mxu0 }
 0x41c   : > { %v1236_v54 = vsel %vm351_vm0, %v2792_v13, -inf }
 0x41d   : > { %v2794_v16 = vpop.f32.mrf.mxu1  ;;  %v2800_v19 = vpop.f32.mrf.mxu0 }
 0x41e   : > { %v1188_v17 = vsel %vm351_vm0, %v2794_v16, -inf  ;;  %v1230_v57 = vsel %vm351_vm0, %v2800_v19, -inf }
 0x41f   : > { %v2798_v18 = vpop.f32.mrf.mxu1  ;;  %1189 = vmax.xlane.f32.xlu0 %v1188_v17  ;;  %v2810_v24 = vpop.f32.mrf.mxu0 }
 0x420   : > { %v1182_v22 = vsel %vm351_vm0, %v2798_v18, -inf  ;;  %v1239_v61 = vsel %vm351_vm0, %v2810_v24, -inf }
 0x421   : > { %v2802_v20 = vpop.f32.mrf.mxu1  ;;  %v2814_v30 = vpop.f32.mrf.mxu0 }
 0x422   : > { %v1191_v21 = vsel %vm351_vm0, %v2802_v20, -inf  ;;  %v1233_v9 = vsel %vm351_vm0, %v2814_v30, -inf }
 0x423   : > { %1192 = vmax.xlane.f32.xlu1 %v1191_v21  ;;  %v2808_v23 = vpop.f32.mrf.mxu1  ;;  %1183 = vmax.xlane.f32.xlu0 %v1182_v22 }
 0x424   : > { %v1185_v27 = vsel %vm351_vm0, %v2808_v23, -inf }
 0x427   : > { %1186 = vmax.xlane.f32.xlu1 %v1185_v27 }
 0x42b   : > { %v2816_v32 = vpop.f32.mrf.mxu0 }
 0x42c   : > { %v1248_v34 = vsel %vm351_vm0, %v2816_v32, -inf }
 0x42d   : > { %v2818_v33 = vpop.f32.mrf.mxu1  ;;  %1249 = vmax.xlane.f32.xlu0 %v1248_v34  ;;  %v2822_v0 = vpop.f32.mrf.mxu0 }
 0x42e   : > { %v1200_v35 = vsel %vm351_vm0, %v2818_v33, -inf  ;;  %v1242_v37 = vsel %vm351_vm0, %v2822_v0, -inf }
 0x42f   : > { %v2824_v2 = vpop.f32.mrf.mxu1  ;;  %v2826_v1 = vpop.f32.mrf.mxu0 }
 0x430   : > { %v1251_v28 = vsel %vm351_vm0, %v2826_v1, -inf  ;;  %v1194_v40 = vsel %vm351_vm0, %v2824_v2, -inf }
 0x431   : > { %v2828_v5 = vpop.f32.mrf.mxu1  ;;  %1201 = vmax.xlane.f32.xlu0 %v1200_v35  ;;  %1252 = vmax.xlane.f32.xlu1 %v1251_v28  ;;  %v2842_v39 = vpop.f32.mrf.mxu0 }
 0x432   : > { %v1203_v38 = vsel %vm351_vm0, %v2828_v5, -inf  ;;  %v1245_v41 = vsel %vm351_vm0, %v2842_v39, -inf }
 0x433   : > { %v2834_v31 = vpop.f32.mrf.mxu1 }
 0x434   : > { %v1197_v45 = vsel %vm351_vm0, %v2834_v31, -inf }
 0x435   : > { %v2836_v36 = vpop.f32.mrf.mxu1  ;;  %1243 = vmax.xlane.f32.xlu0 %v1242_v37  ;;  %1204 = vmax.xlane.f32.xlu1 %v1203_v38 }
 0x436   : > { %v1212_v44 = vsel %vm351_vm0, %v2836_v36, -inf }
 0x437   : > { %v2844_v26 = vpop.f32.mrf.mxu1 }
 0x438   : > { %v1206_v48 = vsel %vm351_vm0, %v2844_v26, -inf }
 0x439   : > { %v2846_v29 = vpop.f32.mrf.mxu1  ;;  %1195 = vmax.xlane.f32.xlu0 %v1194_v40  ;;  %1246 = vmax.xlane.f32.xlu1 %v1245_v41 }
 0x43a   : > { %v1215_v49 = vsel %vm351_vm0, %v2846_v29, -inf }
 0x43b   : > { %v2852_v42 = vpop.f32.mrf.mxu1 }
 0x43c   : > { %v1209_v52 = vsel %vm351_vm0, %v2852_v42, -inf }
 0x43d   : > { %v2854_v43 = vpop.f32.mrf.mxu1  ;;  %1213 = vmax.xlane.f32.xlu0 %v1212_v44  ;;  %1198 = vmax.xlane.f32.xlu1 %v1197_v45 }
 0x43e   : > { %v1224_v55 = vsel %vm351_vm0, %v2854_v43, -inf }
 0x43f   : > { %v2860_v46 = vpop.f32.mrf.mxu1 }
 0x440   : > { %v1218_v51 = vsel %vm351_vm0, %v2860_v46, -inf }
 0x441   : > { %v2862_v47 = vpop.f32.mrf.mxu1  ;;  %1207 = vmax.xlane.f32.xlu0 %v1206_v48  ;;  %1216 = vmax.xlane.f32.xlu1 %v1215_v49 }
 0x442   : > { %v1227_v58 = vsel %vm351_vm0, %v2862_v47, -inf }
 0x443   : > { %v2868_v50 = vpop.f32.mrf.mxu1 }
 0x444   : > { %v1221_v3 = vsel %vm351_vm0, %v2868_v50, -inf }
 0x445   : > { %v2874_v53 = vpop.f32.mrf.mxu1  ;;  %1219 = vmax.xlane.f32.xlu0 %v1218_v51  ;;  %1210 = vmax.xlane.f32.xlu1 %v1209_v52 }
 0x446   : > { %v1260_v60 = vsel %vm351_vm0, %v2874_v53, -inf }
 0x447   : > { %v2880_v56 = vpop.f32.mrf.mxu1 }
 0x448   : > { %v1254_v63 = vsel %vm351_vm0, %v2880_v56, -inf }
 0x449   : > { %1237 = vmax.xlane.f32.xlu0 %v1236_v54  ;;  %1225 = vmax.xlane.f32.xlu1 %v1224_v55  ;;  %v2886_v59 = vpop.f32.mrf.mxu1 }
 0x44a   : > { %v1263_v10 = vsel %vm351_vm0, %v2886_v59, -inf }
 0x44b   : > { %v2892_v62 = vpop.f32.mrf.mxu1 }
 0x44c   : > { %v1257_v17 = vsel %vm351_vm0, %v2892_v62, -inf }
 0x44d   : > { %1231 = vmax.xlane.f32.xlu0 %v1230_v57  ;;  %1228 = vmax.xlane.f32.xlu1 %v1227_v58  ;;  %v2898_v4 = vpop.f32.mrf.mxu1 }
 0x44e   : > { %v1272_v7 = vsel %vm351_vm0, %v2898_v4, -inf }
 0x44f   : > { %v2904_v8 = vpop.f32.mrf.mxu1 }
 0x450   : > { %v1266_v6 = vsel %vm351_vm0, %v2904_v8, -inf }
 0x451   : > { %1261 = vmax.xlane.f32.xlu0 %v1260_v60  ;;  %1240 = vmax.xlane.f32.xlu1 %v1239_v61  ;;  %v2912_v21 = vpop.f32.mrf.mxu1 }
 0x452   : > { %v1275_v22 = vsel %vm351_vm0, %v2912_v21, -inf }
 0x453   : > { %v2916_v27 = vpop.f32.mrf.mxu1 }
 0x454   : > { %v1269_v34 = vsel %vm351_vm0, %v2916_v27, -inf }
 0x455   : > { %1255 = vmax.xlane.f32.xlu0 %v1254_v63  ;;  %1222 = vmax.xlane.f32.xlu1 %v1221_v3 }
 0x459   : > { %1273 = vmax.xlane.f32.xlu0 %v1272_v7  ;;  %1234 = vmax.xlane.f32.xlu1 %v1233_v9 }
 0x45d   : > { %1267 = vmax.xlane.f32.xlu0 %v1266_v6  ;;  %1264 = vmax.xlane.f32.xlu1 %v1263_v10 }
 0x461   : > { %1258 = vmax.xlane.f32.xlu1 %v1257_v17 }
 0x465   : > { %1276 = vmax.xlane.f32.xlu1 %v1275_v22 }
 0x469   : > { %1270 = vmax.xlane.f32.xlu1 %v1269_v34 }
 0x4a8   : > { %v1190_v35 = vpop.xlane.xlu0 %1189 }
 0x4a9   : > { %v1280_v61 = vsub.f32 %v2794_v16, %v1190_v35 }
 0x4ab   : > { %v1314_v9 = vmul.f32 1.442695, %v1280_v61 }
 0x4ac   : > { %v1193_v28 = vpop.xlane.xlu1 %1192  ;;  %v1184_v37 = vpop.xlane.xlu0 %1183 }
 0x4ad   : > { %v1278_v6 = vsub.f32 %v2798_v18, %v1184_v37  ;;  %v1281_v25 = vsub.f32 %v2802_v20, %v1193_v28 }
 0x4af   : > { %v1310_v22 = vmul.f32 1.442695, %v1278_v6 }
 0x4b0   : > { %v1187_v38 = vpop.xlane.xlu1 %1186 }
 0x4b1   : > { %v1279_v18 = vsub.f32 %v2808_v23, %v1187_v38 }
 0x4b6   : > { %v1250_v40 = vpop.xlane.xlu0 %1249 }
 0x4b7   : > { %v1300_v34 = vsub.f32 %v2816_v32, %v1250_v40  ;;  %v1312_v32 = vmul.f32 1.442695, %v1279_v18 }
 0x4b9   : > { %v1354_v35 = vmul.f32 1.442695, %v1300_v34 }
 0x4ba   : > { %v1202_v41 = vpop.xlane.xlu0 %1201  ;;  %v1253_v44 = vpop.xlane.xlu1 %1252 }
 0x4bb   : > { %v1301_v20 = vsub.f32 %v2826_v1, %v1253_v44 }
 0x4bd   : > { %v1356_v23 = vmul.f32 1.442695, %v1301_v20 }
 0x4be   : > { %v1244_v45 = vpop.xlane.xlu0 %1243  ;;  %v1205_v48 = vpop.xlane.xlu1 %1204 }
 0x4bf   : > { %v1285_v38 = vsub.f32 %v2828_v5, %v1205_v48 }
 0x4c2   : > { %v1196_v49 = vpop.xlane.xlu0 %1195  ;;  %v2920_v51 = vpop.xlane.xlu1 %1246 }
 0x4c6   : > { %v1214_v52 = vpop.xlane.xlu0 %1213  ;;  %v2922_v54 = vpop.xlane.xlu1 %1198 }
 0x4c7   : > { %v1288_v40 = vsub.f32 %v2836_v36, %v1214_v52 }
 0x4ca   : > { %v2924_v55 = vpop.xlane.xlu0 %1207  ;;  %v2926_v57 = vpop.xlane.xlu1 %1216 }
 0x4cb   : > { %v1286_v36 = vsub.f32 %v2844_v26, %v2924_v55 }
 0x4cd   : > { %v1326_v26 = vmul.f32 1.442695, %v1286_v36 }
 0x4ce   : > { %v2928_v58 = vpop.xlane.xlu0 %1219  ;;  %v2930_v60 = vpop.xlane.xlu1 %1210 }
 0x4d2   : > { %v1238_v63 = vpop.xlane.xlu0 %1237  ;;  %v2933_v3 = vpop.xlane.xlu1 %1225 }
 0x4d3   : > { %v1296_v7 = vsub.f32 %v2792_v13, %v1238_v63  ;;  %v1284_v13 = vsub.f32 %v2818_v33, %v1202_v41  ;;  %v1316_v63 = vmul.f32 1.442695, %v1281_v25  ;;  %v1292_v55 = vsub.f32 %v2854_v43, %v2933_v3 }
 0x4d4   : > { %v1290_v43 = vsub.f32 %v2860_v46, %v2928_v58 }
 0x4d5   : > { %v1346_v10 = vmul.f32 1.442695, %v1296_v7  ;;  %v1322_v37 = vmul.f32 1.442695, %v1284_v13  ;;  %v1298_v7 = vsub.f32 %v2822_v0, %v1244_v45  ;;  %v1324_v45 = vmul.f32 1.442695, %v1285_v38 }
 0x4d6   : > { %v2937_v17 = vpop.xlane.xlu1 %1228  ;;  %v2954_v0 = vpop.xlane.xlu0 %1231  ;;  %v1338_v3 = vmul.f32 1.442695, %v1292_v55  ;;  %v1334_v58 = vmul.f32 1.442695, %v1290_v43 }
 0x4d7   : > { %2307 = vpow2.f32 %v1346_v10 }
 0x4d8   : > { %2309 = vpow2.f32 %v1314_v9  ;;  %v1330_v9 = vmul.f32 1.442695, %v1288_v40 }
 0x4d9   : > { %2311 = vpow2.f32 %v1310_v22  ;;  %v1283_v22 = vsub.f32 %v2834_v31, %v2922_v54  ;;  %v1289_v54 = vsub.f32 %v2846_v29, %v2926_v57  ;;  %v1287_v57 = vsub.f32 %v2852_v42, %v2930_v60 }
 0x4da   : > { %v1241_v14 = vpop.xlane.xlu1 %1240  ;;  %v1262_v5 = vpop.xlane.xlu0 %1261  ;;  %v1293_v42 = vsub.f32 %v2862_v47, %v2937_v17 }
 0x4db   : > { %v1297_v16 = vsub.f32 %v2810_v24, %v1241_v14  ;;  %v1350_v14 = vmul.f32 1.442695, %v1298_v7  ;;  %v1282_v24 = vsub.f32 %v2824_v2, %v1196_v49  ;;  %v1299_v49 = vsub.f32 %v2842_v39, %v2920_v51 }
 0x4dc   : > { %v1320_v31 = vmul.f32 1.442695, %v1283_v22  ;;  %v1332_v29 = vmul.f32 1.442695, %v1289_v54  ;;  %v1340_v47 = vmul.f32 1.442695, %v1293_v42 }
 0x4dd   : > { %v1348_v61 = vmul.f32 1.442695, %v1297_v16  ;;  %v1318_v1 = vmul.f32 1.442695, %v1282_v24  ;;  %v1352_v10 = vmul.f32 1.442695, %v1299_v49 }
 0x4de   : > { %v2957_v41 = vpop.xlane.xlu1 %1222  ;;  %v2989_v13 = vpop.xlane.xlu0 %1255 }
 0x4df   : > { %2313 = vpow2.f32 %v1348_v61  ;;  %v1291_v17 = vsub.f32 %v2868_v50, %v2957_v41 }
 0x4e0   : > { %2315 = vpow2.f32 %v1354_v35 }
 0x4e1   : > { %2317 = vpow2.f32 %v1316_v63  ;;  %v1336_v50 = vmul.f32 1.442695, %v1291_v17 }
 0x4e2   : > { %2319 = vpow2.f32 %v1322_v37  ;;  %v2979_v34 = vpop.xlane.xlu1 %1234  ;;  %v1274_v46 = vpop.xlane.xlu0 %1273 }
 0x4e3   : > { %2321 = vpow2.f32 %v1312_v32  ;;  %v1308_v40 = vsub.f32 %v2898_v4, %v1274_v46 }
 0x4e4   : > { %v2946_v28 = vpop.eup %2307  ;;  %2323 = vpow2.f32 %v1350_v14  ;;  %v1304_v14 = vsub.f32 %v2874_v53, %v1262_v5 }
 0x4e5   : > { %v1428_v25 = vsel %vm351_vm0, %v2946_v28, 0.0  ;;  %v2951_v33 = vpop.eup %2309  ;;  %2325 = vpow2.f32 %v1356_v23  ;;  %v1328_v23 = vmul.f32 1.442695, %v1287_v57  ;;  %v1370_v4 = vmul.f32 1.442695, %v1308_v40 }
 0x4e6   : > { %1429 = vadd.xlane.f32.xlu0 %v1428_v25  ;;  %v1380_v2 = vsel %vm351_vm0, %v2951_v33, 0.0  ;;  %v2961_v44 = vpop.eup %2311  ;;  %2327 = vpow2.f32 %v1318_v1  ;;  %v1265_v18 = vpop.xlane.xlu1 %1264  ;;  %v1362_v53 = vmul.f32 1.442695, %v1304_v14 }
 0x4e7   : > { %v1374_v52 = vsel %vm351_vm0, %v2961_v44, 0.0  ;;  %2329 = vpow2.f32 %v1324_v45  ;;  %v1268_v49 = vpop.xlane.xlu0 %1267  ;;  %v1305_v41 = vsub.f32 %v2886_v59, %v1265_v18 }
 0x4e8   : > { %2331 = vpow2.f32 %v1330_v9  ;;  %v1306_v36 = vsub.f32 %v2904_v8, %v1268_v49 }
 0x4e9   : > { %2333 = vpow2.f32 %v1352_v10 }
 0x4ea   : > { %1381 = vadd.xlane.f32.xlu0 %v1380_v2  ;;  %2335 = vpow2.f32 %v1326_v26  ;;  %v3018_v1 = vpop.xlane.xlu1 %1258  ;;  %v1366_v55 = vmul.f32 1.442695, %v1306_v36 }
 0x4eb   : > { %2337 = vpow2.f32 %v1320_v31  ;;  %v1364_v31 = vmul.f32 1.442695, %v1305_v41  ;;  %v1295_v41 = vsub.f32 %v2814_v30, %v2979_v34  ;;  %v1303_v30 = vsub.f32 %v2892_v62, %v3018_v1 }
 0x4ec   : > { %v2965_v48 = vpop.eup %2313  ;;  %2339 = vpow2.f32 %v1338_v3 }
 0x4ed   : > { %v2971_v6 = vpop.eup %2315  ;;  %v1431_v39 = vsel %vm351_vm0, %v2965_v48, 0.0  ;;  %2341 = vpow2.f32 %v1332_v29  ;;  %v1360_v34 = vmul.f32 1.442695, %v1303_v30 }
 0x4ee   : > { %1375 = vadd.xlane.f32.xlu0 %v1374_v52  ;;  %v2977_v51 = vpop.eup %2317  ;;  %1432 = vadd.xlane.f32.xlu1 %v1431_v39  ;;  %v1440_v16 = vsel %vm351_vm0, %v2971_v6, 0.0  ;;  %2343 = vpow2.f32 %v1334_v58  ;;  %v1277_v52 = vpop.xlane.xlu1 %1276 }
 0x4ef   : > { %v2985_v35 = vpop.eup %2319  ;;  %v1383_v61 = vsel %vm351_vm0, %v2977_v51, 0.0  ;;  %2345 = vpow2.f32 %v1328_v23  ;;  %v1309_v54 = vsub.f32 %v2912_v21, %v1277_v52 }
 0x4f0   : > { %v2993_v63 = vpop.eup %2321  ;;  %v1392_v37 = vsel %vm351_vm0, %v2985_v35, 0.0  ;;  %2347 = vpow2.f32 %v1362_v53 }
 0x4f1   : > { %v2999_v7 = vpop.eup %2323  ;;  %v1377_v32 = vsel %vm351_vm0, %v2993_v63, 0.0  ;;  %2349 = vpow2.f32 %v1340_v47 }
 0x4f2   : > { %1441 = vadd.xlane.f32.xlu0 %v1440_v16  ;;  %1384 = vadd.xlane.f32.xlu1 %v1383_v61  ;;  %v3005_v20 = vpop.eup %2325  ;;  %v1434_v24 = vsel %vm351_vm0, %v2999_v7, 0.0  ;;  %2351 = vpow2.f32 %v1370_v4  ;;  %v1271_v43 = vpop.xlane.xlu1 %1270 }
 0x4f3   : > { %v3010_v25 = vpop.eup %2327  ;;  %v1443_v60 = vsel %vm351_vm0, %v3005_v20, 0.0  ;;  %2353 = vpow2.f32 %v1336_v50  ;;  %v1307_v29 = vsub.f32 %v2916_v27, %v1271_v43  ;;  %v307_v50 = vld [vmem:[%s3312_s4 + $0x48] sm:$0xff] }
 0x4f4   : > { %v3016_v38 = vpop.eup %2329  ;;  %v1386_v2 = vsel %vm351_vm0, %v3010_v25, 0.0  ;;  %2355 = vpow2.f32 %v1366_v55  ;;  %v1302_v55 = vsub.f32 %v2880_v56, %v2989_v13 }
 0x4f5   : > { %v3023_v45 = vpop.eup %2331  ;;  %v1395_v5 = vsel %vm351_vm0, %v3016_v38, 0.0  ;;  %2357 = vpow2.f32 %v1364_v31  ;;  %v1368_v58 = vmul.f32 1.442695, %v1307_v29  ;;  %v309_v29 = vld [vmem:[%s3312_s4 + $0x58] sm:$0xff] }
 0x4f6   : > { %1393 = vadd.xlane.f32.xlu0 %v1392_v37  ;;  %1378 = vadd.xlane.f32.xlu1 %v1377_v32  ;;  %v3029_v9 = vpop.eup %2333  ;;  %v1404_v10 = vsel %vm351_vm0, %v3023_v45, 0.0  ;;  %v1372_v37 = vmul.f32 1.442695, %v1309_v54  ;;  %v1358_v31 = vmul.f32 1.442695, %v1302_v55  ;;  %v1294_v54 = vsub.f32 %v2800_v19, %v2954_v0 }
 0x4f7   : > { %v3034_v22 = vpop.eup %2335  ;;  %v1437_v39 = vsel %vm351_vm0, %v3029_v9, 0.0 }
 0x4f8   : > { %v3039_v26 = vpop.eup %2337  ;;  %v1398_v8 = vsel %vm351_vm0, %v3034_v22, 0.0  ;;  %2359 = vpow2.f32 %v1372_v37  ;;  %v308_v37 = vld [vmem:[%s3312_s4 + $0x50] sm:$0xff] }
 0x4f9   : > { %v3043_v16 = vpop.eup %2339  ;;  %v1389_v59 = vsel %vm351_vm0, %v3039_v26, 0.0  ;;  %2361 = vpow2.f32 %v1368_v58  ;;  %v317_v58 = vld [vmem:[%s3314_s6 + $0x18] sm:$0xff] }
 0x4fa   : > { %1435 = vadd.xlane.f32.xlu0 %v1434_v24  ;;  %1444 = vadd.xlane.f32.xlu1 %v1443_v60  ;;  %v3048_v61 = vpop.eup %2341  ;;  %v1416_v3 = vsel %vm351_vm0, %v3043_v16, 0.0 }
 0x4fb   : > { %v3052_v18 = vpop.eup %2343  ;;  %v1407_v21 = vsel %vm351_vm0, %v3048_v61, 0.0 }
 0x4fc   : > { %v3057_v57 = vpop.eup %2345  ;;  %v1410_v32 = vsel %vm351_vm0, %v3052_v18, 0.0 }
 0x4fd   : > { %v3061_v46 = vpop.eup %2347  ;;  %v1401_v14 = vsel %vm351_vm0, %v3057_v57, 0.0 }
 0x4fe   : > { %1387 = vadd.xlane.f32.xlu0 %v1386_v2  ;;  %1396 = vadd.xlane.f32.xlu1 %v1395_v5  ;;  %v3065_v24 = vpop.eup %2349  ;;  %v1452_v27 = vsel %vm351_vm0, %v3061_v46, 0.0 }
 0x4ff   : > { %v3069_v23 = vpop.eup %2351  ;;  %v1419_v42 = vsel %vm351_vm0, %v3065_v24, 0.0 }
 0x500   : > { %v3073_v60 = vpop.eup %2353  ;;  %v1464_v53 = vsel %vm351_vm0, %v3069_v23, 0.0 }
 0x501   : > { %v3077_v40 = vpop.eup %2355  ;;  %v1413_v2 = vsel %vm351_vm0, %v3073_v60, 0.0 }
 0x502   : > { %1405 = vadd.xlane.f32.xlu0 %v1404_v10  ;;  %1438 = vadd.xlane.f32.xlu1 %v1437_v39  ;;  %v3081_v47 = vpop.eup %2357  ;;  %v1458_v17 = vsel %vm351_vm0, %v3077_v40, 0.0  ;;  %v306_v10 = vld [vmem:[%s3312_s4 + $0x40] sm:$0xff]  ;;  %v3321_v39 = vmov 0.0  }
 0x503   : > { %v1455_v49 = vsel %vm351_vm0, %v3081_v47, 0.0  ;;  %2115 = vmatprep.mubr.msk.bf16.mxu0 %vm2503_vm1, %v3321_v39  ;;  %2127 = vmatprep.mubr.msk.bf16.mxu1 %vm2503_vm1, %v3321_v39 }
 0x505   : > { %v3087_v5 = vpop.eup %2359 }
 0x506   : > { %1399 = vadd.xlane.f32.xlu0 %v1398_v8  ;;  %1390 = vadd.xlane.f32.xlu1 %v1389_v59  ;;  %v1467_v4 = vsel %vm351_vm0, %v3087_v5, 0.0  ;;  %v3091_v36 = vpop.eup %2361  ;;  %v1344_v8 = vmul.f32 1.442695, %v1295_v41  ;;  %v1342_v59 = vmul.f32 1.442695, %v1294_v54 }
 0x507   : > { %v1461_v52 = vsel %vm351_vm0, %v3091_v36, 0.0 }
 0x508   : > { %2363 = vpow2.f32 %v1344_v8 }
 0x509   : > { %2365 = vpow2.f32 %v1358_v31 }
 0x50a   : > { %1417 = vadd.xlane.f32.xlu0 %v1416_v3  ;;  %1408 = vadd.xlane.f32.xlu1 %v1407_v21  ;;  %2367 = vpow2.f32 %v1342_v59  ;;  %v315_v21 = vld [vmem:[%s3314_s6 + $0x8] sm:$0xff] }
 0x50b   : > { %2369 = vpow2.f32 %v1360_v34 }
 0x50e   : > { %1411 = vadd.xlane.f32.xlu0 %v1410_v32  ;;  %1402 = vadd.xlane.f32.xlu1 %v1401_v14  ;;  %v314_v32 = vld [vmem:[%s3314_s6] sm:$0xff] }
 0x512   : > { %1453 = vadd.xlane.f32.xlu0 %v1452_v27  ;;  %1420 = vadd.xlane.f32.xlu1 %v1419_v42  ;;  %v316_v27 = vld [vmem:[%s3314_s6 + $0x10] sm:$0xff] }
 0x515   : > { %v3113_v43 = vpop.eup %2363 }
 0x516   : > { %1465 = vadd.xlane.f32.xlu0 %v1464_v53  ;;  %1414 = vadd.xlane.f32.xlu1 %v1413_v2  ;;  %v1425_v3 = vsel %vm351_vm0, %v3113_v43, 0.0  ;;  %v3117_v56 = vpop.eup %2365 }
 0x517   : > { %v1446_v13 = vsel %vm351_vm0, %v3117_v56, 0.0  ;;  %v3121_v19 = vpop.eup %2367 }
 0x518   : > { %v1422_v62 = vsel %vm351_vm0, %v3121_v19, 0.0  ;;  %v3125_v0 = vpop.eup %2369 }
 0x519   : > { %v1449_v1 = vsel %vm351_vm0, %v3125_v0, 0.0 }
 0x51a   : > { %1459 = vadd.xlane.f32.xlu0 %v1458_v17  ;;  %1456 = vadd.xlane.f32.xlu1 %v1455_v49 }
 0x51e   : > { %1468 = vadd.xlane.f32.xlu1 %v1467_v4 }
 0x522   : > { %1462 = vadd.xlane.f32.xlu1 %v1461_v52 }
 0x530   : > { %557 = vperm.xlu0 %2211, %v306_v10  }
 0x533   : > { %562 = vperm.xlu1 %2212, %v307_v50  }
 0x54f   : > { %1426 = vadd.xlane.f32.xlu0 %v1425_v3 }
 0x553   : > { %1447 = vadd.xlane.f32.xlu0 %v1446_v13 }
 0x557   : > { %1423 = vadd.xlane.f32.xlu1 %v1422_v62 }
 0x55b   : > { %1450 = vadd.xlane.f32.xlu1 %v1449_v1 }
 0x569   : > { %567 = vperm.xlu0 %2211, %v308_v37  }
 0x56c   : > { %572 = vperm.xlu1 %2212, %v309_v29  }
 0x56d   : > { %1848 = vperm.xlu0 %2211, %v315_v21  }
 0x56f   : > { %v1430_v14 = vpop.xlane.xlu0 %1429 }
 0x570   : > { %1843 = vperm.xlu1 %2212, %v314_v32   ;;  %2371 = vrcp.f32 %v1430_v14 }
 0x571   : > { %1858 = vperm.xlu0 %2211, %v317_v58  }
 0x573   : > { %v1382_v42 = vpop.xlane.xlu0 %1381 }
 0x574   : > { %1853 = vperm.xlu1 %2212, %v316_v27  }
 0x577   : > { %v1376_v53 = vpop.xlane.xlu0 %1375  ;;  %v1433_v2 = vpop.xlane.xlu1 %1432 }
 0x578   : > { %2373 = vrcp.f32 %v1433_v2 }
 0x57b   : > { %v1442_v17 = vpop.xlane.xlu0 %1441  ;;  %v1385_v49 = vpop.xlane.xlu1 %1384 }
 0x57d   : > { %v2372_v50 = vpop.eup %2371 }
 0x57e   : > { %v3150_v31 = vmul.f32 %v2372_v50, %v2946_v28 }
 0x57f   : > { %v1394_v4 = vpop.xlane.xlu0 %1393  ;;  %v1379_v52 = vpop.xlane.xlu1 %1378 }
 0x580   : > { %2375 = vrcp.f32 %v1394_v4 }
 0x583   : > { %v3147_v10 = vpop.xlane.xlu0 %1435  ;;  %v1445_v41 = vpop.xlane.xlu1 %1444 }
 0x585   : > { %v2374_v55 = vpop.eup %2373 }
 0x586   : > { %v3153_v54 = vmul.f32 %v2374_v55, %v2965_v48 }
 0x587   : > { %v1388_v8 = vpop.xlane.xlu0 %1387  ;;  %v1397_v59 = vpop.xlane.xlu1 %1396 }
 0x588   : > { %2377 = vrcp.f32 %v1397_v59  ;;  %v1543_v30 = vpack.c.bf16 %v3153_v54, %v3150_v31 }
 0x589   : > { %2379 = vrcp.f32 %v1388_v8 }
 0x58b   : > { %v1406_v34 = vpop.xlane.xlu0 %1405  ;;  %v1439_v3 = vpop.xlane.xlu1 %1438 }
 0x58d   : > { %v2376_v1 = vpop.eup %2375 }
 0x58e   : > { %v1508_v48 = vmul.f32 %v2376_v1, %v2985_v35 }
 0x58f   : > { %v3157_v13 = vpop.xlane.xlu0 %1399  ;;  %v1391_v62 = vpop.xlane.xlu1 %1390 }
 0x590   : > { %2381 = vrcp.f32 %v1391_v62 }
 0x591   : > { %2383 = vrcp.f32 %v1385_v49 }
 0x592   : > { %2385 = vrcp.f32 %v1382_v42 }
 0x593   : > { %v1409_v37 = vpop.xlane.xlu1 %1408  ;;  %v1418_v29 = vpop.xlane.xlu0 %1417  ;;  %2387 = vrcp.f32 %v1379_v52 }
 0x594   : > { %2389 = vrcp.f32 %v1418_v29 }
 0x595   : > { %v2378_v28 = vpop.eup %2377  ;;  %2391 = vrcp.f32 %v1376_v53 }
 0x596   : > { %v1509_v21 = vmul.f32 %v2378_v28, %v3016_v38  ;;  %v2380_v27 = vpop.eup %2379 }
 0x597   : > { %v1403_v32 = vpop.xlane.xlu1 %1402  ;;  %v1412_v2 = vpop.xlane.xlu0 %1411  ;;  %v1506_v4 = vmul.f32 %v2380_v27, %v3010_v25 }
 0x598   : > { %v1537_v58 = vpack.c.bf16 %v1509_v21, %v1508_v48 }
 0x59a   : > { %v1563_v14 = vsel %vm351_vm0, %v1537_v58, 0 }
 0x59b   : > { %2108 = vmatpush3.bf16.xpose.msra.mxu0 %v1563_v14  ;;  %v1421_v49 = vpop.xlane.xlu1 %1420  ;;  %v3165_v8 = vpop.xlane.xlu0 %1453 }
 0x59c   : > { %2393 = vrcp.f32 %v1421_v49  ;;  %2109 = vmatprep.subr.bf16.mxu0 %v3321_v39 }
 0x59d   : > { %v2382_v42 = vpop.eup %2381  ;;  %2395 = vrcp.f32 %v1412_v2 }
 0x59e   : > { %v1507_v35 = vmul.f32 %v2382_v42, %v3039_v26  ;;  %v2384_v38 = vpop.eup %2383 }
 0x59f   : > { %v1415_v50 = vpop.xlane.xlu1 %1414  ;;  %v2386_v55 = vpop.eup %2385  ;;  %v1505_v59 = vmul.f32 %v2384_v38, %v2977_v51 }
 0x5a0   : > { %2397 = vrcp.f32 %v1415_v50  ;;  %v1536_v52 = vpack.c.bf16 %v1507_v35, %v1506_v4  ;;  %v1504_v25 = vmul.f32 %v2386_v55, %v2951_v33  ;;  %v2388_v26 = vpop.eup %2387  ;;  %v1466_v28 = vpop.xlane.xlu0 %1465 }
 0x5a1   : > { %2399 = vrcp.f32 %v1445_v41  ;;  %v2390_v1 = vpop.eup %2389 }
 0x5a2   : > { %v1560_v53 = vsel %vm351_vm0, %v1536_v52, 0  ;;  %2401 = vrcp.f32 %v1442_v17  ;;  %v1535_v62 = vpack.c.bf16 %v1505_v59, %v1504_v25  ;;  %v2392_v29 = vpop.eup %2391  ;;  %v1516_v21 = vmul.f32 %v2390_v1, %v3043_v16 }
 0x5a3   : > { %2110 = vmatpush3.bf16.xpose.msra.mxu0 %v1560_v53  ;;  %2403 = vrcp.f32 %v1409_v37  ;;  %v1503_v17 = vmul.f32 %v2388_v26, %v2993_v63  ;;  %v1502_v37 = vmul.f32 %v2392_v29, %v2961_v44 }
 0x5a4   : > { %2111 = vmatprep.subr.bf16.mxu0 %v3321_v39  ;;  %2405 = vrcp.f32 %v1406_v34  ;;  %v1557_v41 = vsel %vm351_vm0, %v1535_v62, 0  ;;  %v1460_v14 = vpop.xlane.xlu0 %1459 }
 0x5a5   : > { %2407 = vrcp.f32 %v1439_v3  ;;  %v1457_v3 = vpop.xlane.xlu1 %1456  ;;  %v1534_v16 = vpack.c.bf16 %v1503_v17, %v1502_v37 }
 0x5a6   : > { %2409 = vrcp.f32 %v3147_v10 }
 0x5a7   : > { %2411 = vrcp.f32 %v1403_v32  ;;  %v1554_v44 = vsel %vm351_vm0, %v1534_v16, 0 }
 0x5a8   : > { %2413 = vrcp.f32 %v3157_v13 }
 0x5a9   : > { %v2394_v48 = vpop.eup %2393  ;;  %v1469_v35 = vpop.xlane.xlu1 %1468 }
 0x5aa   : > { %v1517_v51 = vmul.f32 %v2394_v48, %v3065_v24  ;;  %v2396_v58 = vpop.eup %2395  ;;  %2415 = vrcp.f32 %v1469_v35 }
 0x5ab   : > { %2112 = vmatpush3.bf16.xpose.msra.mxu0 %v1557_v41  ;;  %v1514_v63 = vmul.f32 %v2396_v58, %v3052_v18  ;;  %v558_v49 = vpop.permute.xlu0 %557  ;;  %2417 = vrcp.f32 %v1466_v28 }
 0x5ac   : > { %v1541_v33 = vpack.c.bf16 %v1517_v51, %v1516_v21  ;;  %2113 = vmatprep.subr.bf16.mxu0 %v3321_v39 }
 0x5ad   : > { %v2398_v34 = vpop.eup %2397  ;;  %v1463_v62 = vpop.xlane.xlu1 %1462 }
 0x5ae   : > { %v1618_v27 = vsel %vm351_vm0, %v1541_v33, 0  ;;  %v1515_v24 = vmul.f32 %v2398_v34, %v3073_v60  ;;  %v2400_v2 = vpop.eup %2399  ;;  %v691_v60 = vadd.f32 %v2786_v12, %v558_v49  ;;  %2419 = vrcp.f32 %v1463_v62 }
 0x5af   : > { %2120 = vmatpush3.bf16.xpose.msra.mxu1 %v1618_v27  ;;  %v2402_v10 = vpop.eup %2401  ;;  %v1525_v32 = vmul.f32 %v2400_v2, %v3005_v20  ;;  %2421 = vrcp.f32 %v1460_v14  ;;  %v1667_v33 = vsel %vm351_vm0, %v1543_v30, 0 }
 0x5b0   : > { %2121 = vmatprep.subr.bf16.mxu1 %v3321_v39  ;;  %v1540_v42 = vpack.c.bf16 %v1515_v24, %v1514_v63  ;;  %v2404_v4 = vpop.eup %2403  ;;  %v1524_v13 = vmul.f32 %v2402_v10, %v2971_v6  ;;  %v857_v20 = vpack.c.bf16 %v691_v60, %v691_v60  ;;  %2423 = vrcp.f32 %v1457_v3 }
 0x5b1   : > { %v2406_v38 = vpop.eup %2405  ;;  %v1513_v55 = vmul.f32 %v2404_v4, %v3048_v61  ;;  %v563_v51 = vpop.permute.xlu1 %562  ;;  %2425 = vrcp.f32 %v3165_v8 }
 0x5b2   : > { %v2408_v50 = vpop.eup %2407  ;;  %v1615_v18 = vsel %vm351_vm0, %v1540_v42, 0  ;;  %v1545_v52 = vpack.c.bf16 %v1525_v32, %v1524_v13  ;;  %v1512_v53 = vmul.f32 %v2406_v38, %v3023_v45  ;;  %v694_v58 = vadd.f32 %v2790_v15, %v563_v51 }
 0x5b3   : > { %2114 = vmatpush3.bf16.xpose.msra.mxu0 %v1554_v44  ;;  %v2410_v12 = vpop.eup %2409  ;;  %v1523_v25 = vmul.f32 %v2408_v50, %v3029_v9 }
 0x5b4   : > { %2131 = vmatprep.subr.bf16.mxu0 %v3321_v39  ;;  %v1673_v6 = vsel %vm351_vm0, %v1545_v52, 0  ;;  %v1539_v59 = vpack.c.bf16 %v1513_v55, %v1512_v53  ;;  %v2412_v26 = vpop.eup %2411  ;;  %v1522_v61 = vmul.f32 %v2410_v12, %v2999_v7  ;;  %v858_v14 = vpack.c.bf16 %v694_v58, %v694_v58  ;;  %v2435_v58 = vld [vmem:[%s2600_s17 + $0x10] sm:$0xff] }
 0x5b5   : > { %v2414_v1 = vpop.eup %2413  ;;  %v1511_v29 = vmul.f32 %v2412_v26, %v3057_v57 }
 0x5b6   : > { %v1612_v45 = vsel %vm351_vm0, %v1539_v59, 0  ;;  %v1544_v28 = vpack.c.bf16 %v1523_v25, %v1522_v61  ;;  %v1510_v9 = vmul.f32 %v2414_v1, %v3034_v22 }
 0x5b7   : > { %2122 = vmatpush3.bf16.xpose.msra.mxu1 %v1615_v18  ;;  %v2416_v21 = vpop.eup %2415 }
 0x5b8   : > { %2123 = vmatprep.subr.bf16.mxu1 %v3321_v39  ;;  %v1670_v48 = vsel %vm351_vm0, %v1544_v28, 0  ;;  %v1538_v41 = vpack.c.bf16 %v1511_v29, %v1510_v9  ;;  %v2418_v7 = vpop.eup %2417  ;;  %v1533_v57 = vmul.f32 %v2416_v21, %v3087_v5 }
 0x5b9   : > { %v1532_v22 = vmul.f32 %v2418_v7, %v3069_v23  ;;  %v2304_v7 = vld [vmem:[%s3313_s5 + $0x8] sm:$0xff]  }
 0x5ba   : > { %2116 = vmatmul.mubr.msk.bf16.vlgmr.msra.gmra.mxu0 %vm351_vm0, %v857_v20  ;;  %v1609_v17 = vsel %vm351_vm0, %v1538_v41, 0 }
 0x5bb   : > { %2132 = vmatpush3.bf16.xpose.msra.mxu0 %v1673_v6  ;;  %2139 = vmatprep.mubr.msk.bf16.mxu0 %vm2503_vm1, %v3321_v39  ;;  %v1549_v37 = vpack.c.bf16 %v1533_v57, %v1532_v22  ;;  %v2420_v34 = vpop.eup %2419 }
 0x5bc   : > { %2133 = vmatprep.subr.bf16.mxu0 %v3321_v39  ;;  %v2422_v5 = vpop.eup %2421  ;;  %v1531_v8 = vmul.f32 %v2420_v34, %v3091_v36 }
 0x5bd   : > { %v1728_v15 = vsel %vm351_vm0, %v1549_v37, 0  ;;  %v1530_v23 = vmul.f32 %v2422_v5, %v3077_v40  ;;  %v2424_v54 = vpop.eup %2423 }
 0x5be   : > { %v2426_v30 = vpop.eup %2425  ;;  %v1529_v27 = vmul.f32 %v2424_v54, %v3081_v47 }
 0x5bf   : > { %2124 = vmatpush3.bf16.xpose.msra.mxu1 %v1612_v45  ;;  %v1548_v31 = vpack.c.bf16 %v1531_v8, %v1530_v23  ;;  %v1528_v36 = vmul.f32 %v2426_v30, %v3061_v46  ;;  %v2437_v23 = vld [vmem:[%s2600_s17 + $0x18] sm:$0xff] }
 0x5c0   : > { %2125 = vmatprep.subr.bf16.mxu1 %v3321_v39 }
 0x5c1   : > { %v1725_v3 = vsel %vm351_vm0, %v1548_v31, 0  ;;  %v1547_v24 = vpack.c.bf16 %v1529_v27, %v1528_v36  ;;  %v2438_v27 = vld [vmem:[%s2600_s17 + $0x8] sm:$0xff] }
 0x5c3   : > { %2134 = vmatpush3.bf16.xpose.msra.mxu0 %v1670_v48  ;;  %v1722_v2 = vsel %vm351_vm0, %v1547_v24, 0 }
 0x5c4   : > { %2135 = vmatprep.subr.bf16.mxu0 %v3321_v39 }
 0x5c7   : > { %2126 = vmatpush3.bf16.xpose.msra.mxu1 %v1609_v17 }
 0x5c8   : > { %2143 = vmatprep.subr.bf16.mxu1 %v3321_v39 }
 0x5cb   : > { %2136 = vmatpush3.bf16.xpose.msra.mxu0 %v1667_v33 }
 0x5cc   : > { %2137 = vmatprep.subr.bf16.mxu0 %v3321_v39 }
 0x5ce   : > { %2128 = vmatmul.mubr.msk.bf16.vlgmr.msra.gmra.mxu1 %vm351_vm0, %v858_v14  ;;  %v2436_v14 = vld [vmem:[%s2600_s17] sm:$0xff]  ;;  %s2439_s17 = scalar_lea.vmem %s3262_s20, 512 }
 0x5cf   : > { %2144 = vmatpush3.bf16.xpose.msra.mxu1 %v1728_v15  ;;  %2151 = vmatprep.mubr.msk.bf16.mxu1 %vm2503_vm1, %v3321_v39  ;;  %p2440_p11 = scmp.ne.s32.totalorder %s3262_s20, %s2439_s17  ;;  %p2447_p1 = scmp.lt.s32.totalorder %s2445_s13, %s2439_s17 }
 0x5d0   : > { %2145 = vmatprep.subr.bf16.mxu1 %v3321_v39 }
 0x5d1   : > { %p2441_p12 = pnand %p2440_p11, %p2585_p5  ;;  %p2448_p2 = por %p2447_p1, %p2446_p0 }
 0x5d3   : > { %p2442_p13 = pneg %p2441_p12 }
 0x5d5   : > { %p2449_p3 = pnand %p2448_p2, %p2442_p13 }
 0x5d7   : > { %2146 = vmatpush3.bf16.xpose.msra.mxu1 %v1725_v3 }
 0x5d8   : > { %2147 = vmatprep.subr.bf16.mxu1 %v3321_v39  ;;  %v1427_v16 = vpop.xlane.xlu0 %1426 }
 0x5d9   : > { %2427 = vrcp.f32 %v1427_v16 }
 0x5dc   : > { %v1448_v63 = vpop.xlane.xlu0 %1447 }
 0x5df   : > { %2148 = vmatpush3.bf16.xpose.msra.mxu1 %v1722_v2 }
 0x5e0   : > { %v1424_v40 = vpop.xlane.xlu1 %1423  ;;  %2149 = vmatprep.subr.bf16.mxu1 %v3321_v39 }
 0x5e1   : > { %2429 = vrcp.f32 %v1424_v40 }
 0x5e2   : > { %2431 = vrcp.f32 %v1448_v63 }
 0x5e4   : > { %v1451_v10 = vpop.xlane.xlu1 %1450  ;;  %v568_v35 = vpop.permute.xlu0 %567 }
 0x5e5   : > { %2433 = vrcp.f32 %v1451_v10  ;;  %v699_v38 = vadd.f32 %v2784_v11, %v568_v35 }
 0x5e6   : > { %v2428_v47 = vpop.eup %2427 }
 0x5e7   : > { %v1519_v46 = vmul.f32 %v2428_v47, %v3113_v43  ;;  %v3322_v43 = vld [vmem:[#allocation5_spill] sm:$0xff] }
 0x5e8   : > { %v573_v18 = vpop.permute.xlu1 %572  ;;  %v1849_v17 = vpop.permute.xlu0 %1848 }
 0x5e9   : > { %v702_v55 = vadd.f32 %v3322_v43, %v573_v18 }
 0x5eb   : > { %v860_v20 = vpack.c.bf16 %v702_v55, %v702_v55 }
 0x5ec   : > { %v1844_v51 = vpop.permute.xlu1 %1843  ;;  %v1859_v54 = vpop.permute.xlu0 %1858 }
 0x5ee   : > { %v2430_v49 = vpop.eup %2429 }
 0x5ef   : > { %v1518_v44 = vmul.f32 %v2430_v49, %v3121_v19  ;;  %v2432_v42 = vpop.eup %2431  ;;  %v859_v19 = vpack.c.bf16 %v699_v38, %v699_v38 }
 0x5f0   : > { %v1526_v13 = vmul.f32 %v2432_v42, %v3117_v56  ;;  %v2303_v56 = vld [vmem:[%s3313_s5] sm:$0xff]   ;;  %v1854_v33 = vpop.permute.xlu1 %1853 }
 0x5f1   : > { %v1542_v32 = vpack.c.bf16 %v1519_v46, %v1518_v44 }
 0x5f2   : > { %v2434_v4 = vpop.eup %2433 }
 0x5f3   : > { %v1664_v60 = vsel %vm351_vm0, %v1542_v32, 0  ;;  %v1527_v39 = vmul.f32 %v2434_v4, %v3125_v0 }
 0x5f4   : > { %2138 = vmatpush3.bf16.xpose.msra.mxu0 %v1664_v60 }
 0x5f5   : > { %v1546_v50 = vpack.c.bf16 %v1527_v39, %v1526_v13 }
 0x5f7   : > { %v1719_v52 = vsel %vm351_vm0, %v1546_v50, 0 }
 0x5f8   : > { %2150 = vmatpush3.bf16.xpose.msra.mxu1 %v1719_v52 }
 0x5fb   : > { %2140 = vmatmul.mubr.msk.bf16.vlgmr.msra.gmra.mxu0 %vm351_vm0, %v859_v19 }
 0x5fc   : > { %2159 = vmatprep.mubr.msk.bf16.mxu0 %vm605_vm14, %v2303_v56 }
 0x5ff   : > { %2152 = vmatmul.mubr.msk.bf16.vlgmr.msra.gmra.mxu1 %vm351_vm0, %v860_v20 }
 0x67a   : > { %v1599_v11 = vpop.f32.mrf.mxu0 }
 0x67c   : > { %v2117_v0 = vpop.f32.mrf.mxu0 }
 0x67e   : > { %v1602_v53 = vpop.f32.mrf.mxu0 }
 0x680   : > { %v2118_v12 = vpop.f32.mrf.mxu0 }
 0x68e   : > { %v1654_v6 = vpop.f32.mrf.mxu1 }
 0x68f   : > { %v1770_v48 = vpack.c.bf16 %v1654_v6, %v1599_v11 }
 0x690   : > { %v2129_v59 = vpop.f32.mrf.mxu1 }
 0x692   : > { %v1657_v25 = vpop.f32.mrf.mxu1 }
 0x694   : > { %v2130_v26 = vpop.f32.mrf.mxu1 }
 0x6bb   : > { %v1709_v62 = vpop.f32.mrf.mxu0 }
 0x6bd   : > { %v2141_v61 = vpop.f32.mrf.mxu0 }
 0x6bf   : > { %v1712_v1 = vpop.f32.mrf.mxu0  ;;  %v1764_v45 = vpop.f32.mrf.mxu1 }
 0x6c0   : > { %v1771_v28 = vpack.c.bf16 %v1764_v45, %v1709_v62 }
 0x6c1   : > { %v2142_v29 = vpop.f32.mrf.mxu0  ;;  %v2153_v9 = vpop.f32.mrf.mxu1 }
 0x6c2   : > { %2155 = vmatprep.subr.bf16.mxu0 %v1771_v28 }
 0x6c3   : > { %v1767_v41 = vpop.f32.mrf.mxu1  ;;  %2156 = vmatpush3.bf16.msra.mxu0 %v1771_v28 }
 0x6c4   : > { %2157 = vmatprep.subr.bf16.mxu0 %v1770_v48 }
 0x6c5   : > { %v2154_v21 = vpop.f32.mrf.mxu1 }
 0x6c7   : > { %2158 = vmatpush3.bf16.msra.mxu0 %v1770_v48 }
 0x6ca   : > { %2160 = vmatmul.mubr.msk.bf16.vlgmr.msra.gmra.mxu0 %vm605_vm14, %v2304_v7 }
 0x78a   : > { %v2161_v57 = vpop.f32.mrf.mxu0 }
 0x78b   : > { %v1839_v22 = vadd.f32 %v2435_v58, %v2161_v57 }
 0x78c   : > { %v1822_v37 = vpop.f32.mrf.mxu0 }
 0x78d   : > { %v1863_v34 = vadd.f32 %v1854_v33, %v1839_v22  ;;  %v1837_v5 = vadd.f32 %v2436_v14, %v1822_v37 }
 0x78e   : > { %v2162_v15 = vpop.f32.mrf.mxu0 }
 0x78f   : > { %1867 = vst.msk [vmem:[%s271_s19 + $0x10] sm:$0xff] %vm351_vm0, %v1863_v34  ;;  %v1861_v8 = vadd.f32 %v1844_v51, %v1837_v5  ;;  %v1840_v31 = vadd.f32 %v2437_v23, %v2162_v15 }
 0x790   : > { %v1825_v30 = vpop.f32.mrf.mxu0 }
 0x791   : > { %1865 = vst.msk [vmem:[%s271_s19] sm:$0xff] %vm351_vm0, %v1861_v8  ;;  %v1864_v3 = vadd.f32 %v1859_v54, %v1840_v31  ;;  %v1838_v36 = vadd.f32 %v2438_v27, %v1825_v30 }
 0x793   : > { %1868 = vst.msk [vmem:[%s271_s19 + $0x18] sm:$0xff] %vm351_vm0, %v1864_v3  ;;  %v1862_v16 = vadd.f32 %v1849_v17, %v1838_v36 }
 0x795   : > { %1866 = vst.msk [vmem:[%s271_s19 + $0x8] sm:$0xff] %vm351_vm0, %v1862_v16 }
 0x796   : > { %2452 = shalt.err (!%p2449_p3)
}
 0x797   : > { %s2453_s14 = scalar_lea.hbm %s3260_s29, 512  ;;  %s2457_s18 = scalar_lea.hbm %s3315_s7, 1024 }
 0x798   : > { %p2454_p4 = scmp.ne.s32.totalorder %s3260_s29, %s2453_s14  ;;  %p2458_p9 = scmp.lt.s32.totalorder %s3260_s29, %s3315_s7 }
 0x799   : > { %p2459_p10 = scmp.lt.s32.totalorder %s2457_s18, %s2453_s14 }
 0x79a   : > { %p2455_p7 = pnand %p2454_p4, %p2585_p5 }
 0x79b   : > { %p2460_p11 = por %p2459_p10, %p2458_p9 }
 0x79c   : > { %p2456_p8 = pneg %p2455_p7 }
 0x79e   : > { %p2461_p12 = pnand %p2460_p11, %p2456_p8 }
 0x7a0   : > { %2464 = shalt.err (!%p2461_p12)
}
 0x7a1   : > { %s2505_s22 = smov 128   ;;  %s2506_s23 = smov 8  }
 0x7a2   : > { %2167 = dma.vmem_to_hbm [thread:$0]  (%p2585_p5), %s3262_s20, 512, %s3260_s29, %s3268_s28, %s2505_s22, %s2505_s22, %s2506_s23  }
 0x7a3 PF: > { %p2173_p13 = scmp.ge.s32.totalorder %s2499_s27, 2  ;;  %s1898_s17 = sand.u32 1, %s2487_s24  }
 0x7a4   : > { %s1899_s8 = scalar_lea.sflag [#allocation3], %s1898_s17 }
 0x7a5   : > { %p2170_p0 = pnand %p2173_p13, %p2589_p6 }
 0x7a7   : > { %p2171_p1 = pneg %p2170_p0 }
 0x7a9   : > { %2482 = dma.done.wait (%p2171_p1), %s1899_s8, 512  }
 0x7aa   : > { %2484 = vsyncadd (%p2171_p1), %s1899_s8, 4294966784  ;;  %p17_p2 = scmp.ge.s32.totalorder %s2572_s30, 4   ;;  %s3323_s24 = smov %s2491_s25 }
 0x7ab   : > { %s3324_s25 = smov %s2495_s26  ;;  %s3325_s26 = smov %s2583_s10 }
 0x7ac   : > { %s3326_s27 = smov %s2572_s30  ;;  %19 = sbr.rel (!%p17_p2) target bundleno = 3 (0x3), region = 83 }
 0x7b1   :  { %1904 = vsyncpa [#allocation3], 1 }
 0x7b2   :  { %1906 = vsyncpa [#allocation3 + $0x1], 1 }

</bundles_post_ra>
